<compile_context>
chip_gen: v7x
topology: tpu7x:2x2x1
jax: 0.10.0
libtpu: 0.0.40
codegen_flags: <defaults>
</compile_context>

<pallas_src>
import jax
import jax.numpy as jnp
from jax.experimental import pallas as pl
from jax.experimental.pallas import tpu as pltpu

IN_FEATURES = 28 * 28        # 784, fixed by the module
HIDDEN = 500
SUPPORT_Z = 8

IN_P = 896                   # 784 padded to 7*128
HID_P = 512                  # 500 padded to 4*128
ZP = 128                     # latent dim padded to one lane tile


def _round_up(n, m):
    return ((n + m - 1) // m) * m


def vae_kernel(x_ref, eps_ref,
               w1t_ref, b1_ref, w2t_ref, b2_ref,
               w3t_ref, b3_ref, w4t_ref, b4_ref,
               ms_ref, out_ref):
    # Encoder hidden: relu(x @ W1^T + b1)   (bf16 operands, f32 accumulate)
    x = x_ref[...].astype(jnp.bfloat16)
    h1 = jnp.dot(x, w1t_ref[...], preferred_element_type=jnp.float32) + b1_ref[...]
    h1 = jnp.maximum(h1, 0.0)

    # Fused encoder head: one matmul produces [mean | std] (each ZP wide).
    y = jnp.dot(h1.astype(jnp.bfloat16), w2t_ref[...],
                preferred_element_type=jnp.float32) + b2_ref[...]
    mean = y[:, :ZP]
    std = jnp.maximum(y[:, ZP:], 0.0)          # torch.relu on the std half
    ms_ref[...] = jnp.concatenate([mean, std], axis=-1)

    # Reparameterization: z = mean + std * epsilon  (padded cols are all zero)
    z = mean + std * eps_ref[...]

    # Decoder: relu(z @ W3^T + b3) -> sigmoid(h @ W4^T + b4)
    h2 = jnp.dot(z.astype(jnp.bfloat16), w3t_ref[...],
                 preferred_element_type=jnp.float32) + b3_ref[...]
    h2 = jnp.maximum(h2, 0.0)
    logits = jnp.dot(h2.astype(jnp.bfloat16), w4t_ref[...],
                     preferred_element_type=jnp.float32) + b4_ref[...]
    out_ref[...] = jax.nn.sigmoid(logits)


def init_params(key, support_z=SUPPORT_Z):
    """Deterministic PyTorch-Linear-style init: U(-1/sqrt(fan_in), 1/sqrt(fan_in))."""
    def linear(k, out_f, in_f):
        kw, kb = jax.random.split(k)
        bound = 1.0 / jnp.sqrt(in_f)
        w = jax.random.uniform(kw, (out_f, in_f), jnp.float32, -bound, bound)
        b = jax.random.uniform(kb, (out_f,), jnp.float32, -bound, bound)
        return w, b

    k1, k2, k3, k4 = jax.random.split(key, 4)
    w1, b1 = linear(k1, HIDDEN, IN_FEATURES)            # hidden_encoder
    w2, b2 = linear(k2, 2 * support_z, HIDDEN)          # output_encoder
    w3, b3 = linear(k3, HIDDEN, support_z)              # hidden_decoder
    w4, b4 = linear(k4, IN_FEATURES, HIDDEN)            # output_decoder
    return dict(w1=w1, b1=b1, w2=w2, b2=b2, w3=w3, b3=b3, w4=w4, b4=b4)


def vae_forward(params, x, eps_key, support_z=SUPPORT_Z):
    """x: (B, C, 28, 28) float32. Returns (mean, std, recon) like the PyTorch module."""
    B, C = x.shape[0], x.shape[1]
    Z = support_z
    M = B * C

    x_flat = x.reshape(M, IN_FEATURES).astype(jnp.float32)

    # epsilon ~ N(0, I), shape (B, 1, Z) like standard_normal.sample([B, 1]);
    # broadcast over the C axis (per-row eps), then zero-pad the lane dim.
    eps = jax.random.normal(eps_key, (B, 1, Z), jnp.float32)
    eps_flat = jnp.broadcast_to(eps, (B, C, Z)).reshape(M, Z)

    # Row tiling: TILE_M up to 512, padded M so the grid divides evenly.
    tile_m = min(512, _round_up(M, 8))
    m_pad = _round_up(M, tile_m)
    grid = (m_pad // tile_m,)

    x_p = jnp.zeros((m_pad, IN_P), jnp.float32).at[:M, :IN_FEATURES].set(x_flat)
    eps_p = jnp.zeros((m_pad, ZP), jnp.float32).at[:M, :Z].set(eps_flat)

    # Zero-padded, pre-transposed weights; encoder head fused into one
    # (HID_P, 2*ZP) weight with mean columns at [0:Z] and std columns at
    # [ZP:ZP+Z].  Weights go to bf16 for the MXU; biases stay f32.
    w1t = jnp.zeros((IN_P, HID_P), jnp.float32).at[:IN_FEATURES, :HIDDEN].set(params["w1"].T)
    b1 = jnp.zeros((1, HID_P), jnp.float32).at[0, :HIDDEN].set(params["b1"])

    w2t = jnp.zeros((HID_P, 2 * ZP), jnp.float32)
    w2t = w2t.at[:HIDDEN, :Z].set(params["w2"][:Z, :].T)
    w2t = w2t.at[:HIDDEN, ZP:ZP + Z].set(params["w2"][Z:, :].T)
    b2 = jnp.zeros((1, 2 * ZP), jnp.float32)
    b2 = b2.at[0, :Z].set(params["b2"][:Z]).at[0, ZP:ZP + Z].set(params["b2"][Z:])

    w3t = jnp.zeros((ZP, HID_P), jnp.float32).at[:Z, :HIDDEN].set(params["w3"].T)
    b3 = jnp.zeros((1, HID_P), jnp.float32).at[0, :HIDDEN].set(params["b3"])

    w4t = jnp.zeros((HID_P, IN_P), jnp.float32).at[:HIDDEN, :IN_FEATURES].set(params["w4"].T)
    b4 = jnp.zeros((1, IN_P), jnp.float32).at[0, :IN_FEATURES].set(params["b4"])

    w1t = w1t.astype(jnp.bfloat16)
    w2t = w2t.astype(jnp.bfloat16)
    w3t = w3t.astype(jnp.bfloat16)
    w4t = w4t.astype(jnp.bfloat16)

    def row_spec(width):
        return pl.BlockSpec((tile_m, width), lambda i: (i, 0))

    def const_spec(shape):
        return pl.BlockSpec(shape, lambda i: (0, 0))

    ms_f, recon_f = pl.pallas_call(
        vae_kernel,
        out_shape=(
            jax.ShapeDtypeStruct((m_pad, 2 * ZP), jnp.float32),
            jax.ShapeDtypeStruct((m_pad, IN_P), jnp.float32),
        ),
        grid=grid,
        in_specs=[
            row_spec(IN_P),                     # x
            row_spec(ZP),                       # eps
            const_spec((IN_P, HID_P)),          # w1t (resident)
            const_spec((1, HID_P)),             # b1
            const_spec((HID_P, 2 * ZP)),        # w2t (fused mean|std)
            const_spec((1, 2 * ZP)),            # b2
            const_spec((ZP, HID_P)),            # w3t
            const_spec((1, HID_P)),             # b3
            const_spec((HID_P, IN_P)),          # w4t
            const_spec((1, IN_P)),              # b4
        ],
        out_specs=(row_spec(2 * ZP), row_spec(IN_P)),
        compiler_params=pltpu.CompilerParams(
            dimension_semantics=("parallel",),
            vmem_limit_bytes=48 * 1024 * 1024,
        ),
    )(x_p, eps_p, w1t, b1, w2t, b2, w3t, b3, w4t, b4)

    mean = ms_f[:M, :Z].reshape(B, C, Z)
    std = ms_f[:M, ZP:ZP + Z].reshape(B, C, Z)
    recon = recon_f[:M, :IN_FEATURES].reshape(B, C, IN_FEATURES)
    return mean, std, recon


if __name__ == "__main__":
    root = jax.random.PRNGKey(0)
    k_param, k_x, k_eps = jax.random.split(root, 3)

    params = init_params(k_param)
    # Small batch/channel; spatial fixed at 28x28 by the module's Linear(28*28, 500).
    x = jax.random.uniform(k_x, (2, 4, 28, 28), jnp.float32)

    mean, std, recon = vae_forward(params, x, k_eps)
    jax.block_until_ready((mean, std, recon))

    assert mean.shape == (2, 4, SUPPORT_Z)
    assert std.shape == (2, 4, SUPPORT_Z)
    assert recon.shape == (2, 4, 28 * 28)
    assert bool(jnp.all(std >= 0.0))
    assert bool(jnp.all((recon >= 0.0) & (recon <= 1.0)))
    print("KERNEL_OK")
</pallas_src>

<mosaic_0001>
module attributes {stable_mosaic.version = 11 : i64} {
  func.func @vae_kernel(%arg0: i32, %arg1: memref<8x896xf32, #tpu.memory_space<vmem>>, %arg2: memref<8x128xf32, #tpu.memory_space<vmem>>, %arg3: memref<896x512xbf16, #tpu.memory_space<vmem>>, %arg4: memref<1x512xf32, #tpu.memory_space<vmem>>, %arg5: memref<512x256xbf16, #tpu.memory_space<vmem>>, %arg6: memref<1x256xf32, #tpu.memory_space<vmem>>, %arg7: memref<128x512xbf16, #tpu.memory_space<vmem>>, %arg8: memref<1x512xf32, #tpu.memory_space<vmem>>, %arg9: memref<512x896xbf16, #tpu.memory_space<vmem>>, %arg10: memref<1x896xf32, #tpu.memory_space<vmem>>, %arg11: memref<8x256xf32, #tpu.memory_space<vmem>>, %arg12: memref<8x896xf32, #tpu.memory_space<vmem>>) attributes {dimension_semantics = [#tpu.dimension_semantics<parallel>], iteration_bounds = array<i64: 1>, scalar_prefetch = 0 : i64, scratch_operands = 0 : i64, tpu.core_type = #tpu.core_type<tc>, window_params = [{transform_indices = @transform_0, window_bounds = array<i64: 8, 896>}, {transform_indices = @transform_1, window_bounds = array<i64: 8, 128>}, {pipeline_mode = #tpu.pipeline_mode<synchronous>, transform_indices = @transform_2, window_bounds = array<i64: 896, 512>}, {pipeline_mode = #tpu.pipeline_mode<synchronous>, transform_indices = @transform_3, window_bounds = array<i64: 1, 512>}, {pipeline_mode = #tpu.pipeline_mode<synchronous>, transform_indices = @transform_4, window_bounds = array<i64: 512, 256>}, {pipeline_mode = #tpu.pipeline_mode<synchronous>, transform_indices = @transform_5, window_bounds = array<i64: 1, 256>}, {pipeline_mode = #tpu.pipeline_mode<synchronous>, transform_indices = @transform_6, window_bounds = array<i64: 128, 512>}, {pipeline_mode = #tpu.pipeline_mode<synchronous>, transform_indices = @transform_7, window_bounds = array<i64: 1, 512>}, {pipeline_mode = #tpu.pipeline_mode<synchronous>, transform_indices = @transform_8, window_bounds = array<i64: 512, 896>}, {pipeline_mode = #tpu.pipeline_mode<synchronous>, transform_indices = @transform_9, window_bounds = array<i64: 1, 896>}, {transform_indices = @transform_10, window_bounds = array<i64: 8, 256>}, {transform_indices = @transform_11, window_bounds = array<i64: 8, 896>}]} {
    %c0 = arith.constant 0 : index
    %c0_0 = arith.constant 0 : index
    %0 = vector.load %arg1[%c0, %c0_0] : memref<8x896xf32, #tpu.memory_space<vmem>>, vector<8x896xf32>
    %1 = arith.truncf %0 : vector<8x896xf32> to vector<8x896xbf16>
    %c0_1 = arith.constant 0 : index
    %c0_2 = arith.constant 0 : index
    %2 = vector.load %arg3[%c0_1, %c0_2] : memref<896x512xbf16, #tpu.memory_space<vmem>>, vector<896x512xbf16>
    %cst = arith.constant dense<0.000000e+00> : vector<8x512xf32>
    %3 = tpu.matmul %1, %2, %cst {dimension_numbers = #tpu.dot_dimension_numbers<[1], [0], [0], [1], [0, 0, 1, 1], [], []>} : vector<8x896xbf16>, vector<896x512xbf16>, vector<8x512xf32> -> vector<8x512xf32>
    %c0_3 = arith.constant 0 : index
    %c0_4 = arith.constant 0 : index
    %4 = vector.load %arg4[%c0_3, %c0_4] : memref<1x512xf32, #tpu.memory_space<vmem>>, vector<1x512xf32>
    %5 = vector.broadcast %4 : vector<1x512xf32> to vector<8x512xf32>
    %6 = arith.addf %3, %5 : vector<8x512xf32>
    %cst_5 = arith.constant 0.000000e+00 : f32
    %7 = vector.broadcast %cst_5 : f32 to vector<8x512xf32>
    %8 = arith.maximumf %6, %7 : vector<8x512xf32>
    %9 = arith.truncf %8 : vector<8x512xf32> to vector<8x512xbf16>
    %c0_6 = arith.constant 0 : index
    %c0_7 = arith.constant 0 : index
    %10 = vector.load %arg5[%c0_6, %c0_7] : memref<512x256xbf16, #tpu.memory_space<vmem>>, vector<512x256xbf16>
    %cst_8 = arith.constant dense<0.000000e+00> : vector<8x256xf32>
    %11 = tpu.matmul %9, %10, %cst_8 {dimension_numbers = #tpu.dot_dimension_numbers<[1], [0], [0], [1], [0, 0, 1, 1], [], []>} : vector<8x512xbf16>, vector<512x256xbf16>, vector<8x256xf32> -> vector<8x256xf32>
    %c0_9 = arith.constant 0 : index
    %c0_10 = arith.constant 0 : index
    %12 = vector.load %arg6[%c0_9, %c0_10] : memref<1x256xf32, #tpu.memory_space<vmem>>, vector<1x256xf32>
    %13 = vector.broadcast %12 : vector<1x256xf32> to vector<8x256xf32>
    %14 = arith.addf %11, %13 : vector<8x256xf32>
    %15 = vector.extract_strided_slice %14 {offsets = [0, 0], sizes = [8, 128], strides = [1, 1]} : vector<8x256xf32> to vector<8x128xf32>
    %16 = vector.extract_strided_slice %14 {offsets = [0, 128], sizes = [8, 128], strides = [1, 1]} : vector<8x256xf32> to vector<8x128xf32>
    %cst_11 = arith.constant 0.000000e+00 : f32
    %17 = vector.broadcast %cst_11 : f32 to vector<8x128xf32>
    %18 = arith.maximumf %16, %17 : vector<8x128xf32>
    %19 = tpu.concatenate %15, %18 in 1 : vector<8x128xf32>, vector<8x128xf32> -> vector<8x256xf32>
    %c0_12 = arith.constant 0 : index
    %c0_13 = arith.constant 0 : index
    %20 = vector.load %arg11[%c0_12, %c0_13] : memref<8x256xf32, #tpu.memory_space<vmem>>, vector<8x256xf32>
    tpu.vector_store %arg11[%c0_12, %c0_13], %19 {strides = array<i32>} : memref<8x256xf32, #tpu.memory_space<vmem>>, vector<8x256xf32>,
    %c0_14 = arith.constant 0 : index
    %c0_15 = arith.constant 0 : index
    %21 = vector.load %arg2[%c0_14, %c0_15] : memref<8x128xf32, #tpu.memory_space<vmem>>, vector<8x128xf32>
    %22 = arith.mulf %18, %21 : vector<8x128xf32>
    %23 = arith.addf %15, %22 : vector<8x128xf32>
    %24 = arith.truncf %23 : vector<8x128xf32> to vector<8x128xbf16>
    %c0_16 = arith.constant 0 : index
    %c0_17 = arith.constant 0 : index
    %25 = vector.load %arg7[%c0_16, %c0_17] : memref<128x512xbf16, #tpu.memory_space<vmem>>, vector<128x512xbf16>
    %cst_18 = arith.constant dense<0.000000e+00> : vector<8x512xf32>
    %26 = tpu.matmul %24, %25, %cst_18 {dimension_numbers = #tpu.dot_dimension_numbers<[1], [0], [0], [1], [0, 0, 1, 1], [], []>} : vector<8x128xbf16>, vector<128x512xbf16>, vector<8x512xf32> -> vector<8x512xf32>
    %c0_19 = arith.constant 0 : index
    %c0_20 = arith.constant 0 : index
    %27 = vector.load %arg8[%c0_19, %c0_20] : memref<1x512xf32, #tpu.memory_space<vmem>>, vector<1x512xf32>
    %28 = vector.broadcast %27 : vector<1x512xf32> to vector<8x512xf32>
    %29 = arith.addf %26, %28 : vector<8x512xf32>
    %cst_21 = arith.constant 0.000000e+00 : f32
    %30 = vector.broadcast %cst_21 : f32 to vector<8x512xf32>
    %31 = arith.maximumf %29, %30 : vector<8x512xf32>
    %32 = arith.truncf %31 : vector<8x512xf32> to vector<8x512xbf16>
    %c0_22 = arith.constant 0 : index
    %c0_23 = arith.constant 0 : index
    %33 = vector.load %arg9[%c0_22, %c0_23] : memref<512x896xbf16, #tpu.memory_space<vmem>>, vector<512x896xbf16>
    %cst_24 = arith.constant dense<0.000000e+00> : vector<8x896xf32>
    %34 = tpu.matmul %32, %33, %cst_24 {dimension_numbers = #tpu.dot_dimension_numbers<[1], [0], [0], [1], [0, 0, 1, 1], [], []>} : vector<8x512xbf16>, vector<512x896xbf16>, vector<8x896xf32> -> vector<8x896xf32>
    %c0_25 = arith.constant 0 : index
    %c0_26 = arith.constant 0 : index
    %35 = vector.load %arg10[%c0_25, %c0_26] : memref<1x896xf32, #tpu.memory_space<vmem>>, vector<1x896xf32>
    %36 = vector.broadcast %35 : vector<1x896xf32> to vector<8x896xf32>
    %37 = arith.addf %34, %36 : vector<8x896xf32>
    %38 = arith.negf %37 : vector<8x896xf32>
    %39 = math.exp %38 : vector<8x896xf32>
    %cst_27 = arith.constant 1.000000e+00 : f32
    %40 = vector.broadcast %cst_27 : f32 to vector<8x896xf32>
    %41 = arith.addf %40, %39 : vector<8x896xf32>
    %42 = arith.divf %40, %41 : vector<8x896xf32>
    %c0_28 = arith.constant 0 : index
    %c0_29 = arith.constant 0 : index
    %43 = vector.load %arg12[%c0_28, %c0_29] : memref<8x896xf32, #tpu.memory_space<vmem>>, vector<8x896xf32>
    tpu.vector_store %arg12[%c0_28, %c0_29], %42 {strides = array<i32>} : memref<8x896xf32, #tpu.memory_space<vmem>>, vector<8x896xf32>,
    return
  }
  func.func @transform_0(%arg0: i32) -> (i32, i32) {
    %c0_i32 = arith.constant 0 : i32
    %c0_i32_0 = arith.constant 0 : i32
    return %arg0, %c0_i32 : i32, i32
  }
  func.func @transform_1(%arg0: i32) -> (i32, i32) {
    %c0_i32 = arith.constant 0 : i32
    %c0_i32_0 = arith.constant 0 : i32
    return %arg0, %c0_i32 : i32, i32
  }
  func.func @transform_2(%arg0: i32) -> (i32, i32) {
    %c0_i32 = arith.constant 0 : i32
    %c0_i32_0 = arith.constant 0 : i32
    %c0_i32_1 = arith.constant 0 : i32
    return %c0_i32, %c0_i32_0 : i32, i32
  }
  func.func @transform_3(%arg0: i32) -> (i32, i32) {
    %c0_i32 = arith.constant 0 : i32
    %c0_i32_0 = arith.constant 0 : i32
    %c0_i32_1 = arith.constant 0 : i32
    return %c0_i32, %c0_i32_0 : i32, i32
  }
  func.func @transform_4(%arg0: i32) -> (i32, i32) {
    %c0_i32 = arith.constant 0 : i32
    %c0_i32_0 = arith.constant 0 : i32
    %c0_i32_1 = arith.constant 0 : i32
    return %c0_i32, %c0_i32_0 : i32, i32
  }
  func.func @transform_5(%arg0: i32) -> (i32, i32) {
    %c0_i32 = arith.constant 0 : i32
    %c0_i32_0 = arith.constant 0 : i32
    %c0_i32_1 = arith.constant 0 : i32
    return %c0_i32, %c0_i32_0 : i32, i32
  }
  func.func @transform_6(%arg0: i32) -> (i32, i32) {
    %c0_i32 = arith.constant 0 : i32
    %c0_i32_0 = arith.constant 0 : i32
    %c0_i32_1 = arith.constant 0 : i32
    return %c0_i32, %c0_i32_0 : i32, i32
  }
  func.func @transform_7(%arg0: i32) -> (i32, i32) {
    %c0_i32 = arith.constant 0 : i32
    %c0_i32_0 = arith.constant 0 : i32
    %c0_i32_1 = arith.constant 0 : i32
    return %c0_i32, %c0_i32_0 : i32, i32
  }
  func.func @transform_8(%arg0: i32) -> (i32, i32) {
    %c0_i32 = arith.constant 0 : i32
    %c0_i32_0 = arith.constant 0 : i32
    %c0_i32_1 = arith.constant 0 : i32
    return %c0_i32, %c0_i32_0 : i32, i32
  }
  func.func @transform_9(%arg0: i32) -> (i32, i32) {
    %c0_i32 = arith.constant 0 : i32
    %c0_i32_0 = arith.constant 0 : i32
    %c0_i32_1 = arith.constant 0 : i32
    return %c0_i32, %c0_i32_0 : i32, i32
  }
  func.func @transform_10(%arg0: i32) -> (i32, i32) {
    %c0_i32 = arith.constant 0 : i32
    %c0_i32_0 = arith.constant 0 : i32
    return %arg0, %c0_i32 : i32, i32
  }
  func.func @transform_11(%arg0: i32) -> (i32, i32) {
    %c0_i32 = arith.constant 0 : i32
    %c0_i32_0 = arith.constant 0 : i32
    return %arg0, %c0_i32 : i32, i32
  }
}

</mosaic_0001>

<bundles_post_ra>
// kernel: tpu_custom_call.1
= control target key start
LH: loop header
LB: loop body
LE: loop exit
PB: predicated region body
PF: predicated region fallthrough
CT: control target
= control target key end

     0   :  { %17 = vsyncpa [#allocation3], 0  ;;  %s6443_s0 = inlined_call_operand.hbm [shape: f32[8,896], index: 0, kind: input, shape index: {}]   ;;  %s6444_s1 = inlined_call_operand.hbm [shape: f32[8,128], index: 1, kind: input, shape index: {}]   ;;  %s6445_s2 = inlined_call_operand.hbm [shape: bf16[896,512], index: 2, kind: input, shape index: {}]   ;;  %s6446_s3 = inlined_call_operand.vmem [shape: f32[1,512], index: 3, kind: input, shape index: {}]   ;;  %s6447_s4 = inlined_call_operand.hbm [shape: bf16[512,256], index: 4, kind: input, shape index: {}]   ;;  %s6448_s5 = inlined_call_operand.vmem [shape: f32[1,256], index: 5, kind: input, shape index: {}]   ;;  %s6449_s6 = inlined_call_operand.hbm [shape: bf16[128,512], index: 6, kind: input, shape index: {}]   ;;  %s6450_s7 = inlined_call_operand.vmem [shape: f32[1,512], index: 7, kind: input, shape index: {}]   ;;  %s6451_s8 = inlined_call_operand.hbm [shape: bf16[512,896], index: 8, kind: input, shape index: {}]   ;;  %s6452_s9 = inlined_call_operand.vmem [shape: f32[1,896], index: 9, kind: input, shape index: {}]   ;;  %s6453_s10 = inlined_call_operand.hbm [shape: f32[8,256], index: 10, kind: output, shape index: {0}]   ;;  %s6454_s11 = inlined_call_operand.hbm [shape: f32[8,896], index: 11, kind: output, shape index: {1}]  }
   0x1   :  { %18 = vsyncpa [#allocation6], 0 }
   0x2   :  { %19 = vsyncpa [#allocation9], 0 }
   0x3   :  { %20 = vsyncpa [#allocation12], 0 }
   0x4   :  { %21 = vsyncpa [#allocation4], 0 }
   0x5   :  { %22 = vsyncpa [#allocation15], 0  ;;  %s6153_s17 = smov [#allocation5]   ;;  %s6154_s19 = smov [#allocation8]  }
   0x6   :  { %s39_s18 = sshll.u32 %s6153_s17, 4  ;;  %s62_s20 = sshll.u32 %s6154_s19, 4  ;;  %s40_s18 = int_to_ptr.vmem [resolvable:$true] %s39_s18  ;;  %s6228_s20 = int_to_ptr.vmem [resolvable:$true] %s62_s20 }
   0x7   :  { %s5965_s23 = scalar_lea.hbm %s6444_s1, 128 }
   0x8   :  { %p5966_p0 = scmp.ne.s32.totalorder %s6444_s1, %s5965_s23  ;;  %p5969_p1 = scmp.lt.u32.totalorder %s5965_s23, %s6444_s1 }
   0xa   :  { %p5971_p2 = pnand %p5969_p1, %p5966_p0 }
   0xc   :  { %5974 = shalt.err (!%p5971_p2)
}
   0xd   :  { %s5975_s28 = scalar_lea.vmem %s40_s18, 128  ;;  %p5980_p4 = scmp.lt.s32.totalorder %s40_s18, %s40_s18 }
   0xe   :  { %p5976_p3 = scmp.ne.s32.totalorder %s40_s18, %s5975_s28  ;;  %p5981_p5 = scmp.lt.s32.totalorder %s5975_s28, %s5975_s28 }
  0x10   :  { %p5982_p6 = por %p5981_p5, %p5980_p4 }
  0x12   :  { %p5983_p7 = pnand %p5982_p6, %p5976_p3 }
  0x14   :  { %5986 = shalt.err (!%p5983_p7)
}
  0x15   :  { %42 = dma.hbm_to_vmem [thread:$0]  %s6444_s1, 128, %s40_s18, [#allocation6]  }
  0x16   :  { %s5987_s14 = scalar_lea.hbm %s6447_s4, 8192 }
  0x17   :  { %p5988_p8 = scmp.ne.s32.totalorder %s6447_s4, %s5987_s14  ;;  %p5991_p9 = scmp.lt.u32.totalorder %s5987_s14, %s6447_s4 }
  0x19   :  { %p5993_p10 = pnand %p5991_p9, %p5988_p8 }
  0x1b   :  { %5996 = shalt.err (!%p5993_p10)
}
  0x1c   :  { %s5997_s21 = scalar_lea.vmem %s6228_s20, 8192  ;;  %p6002_p12 = scmp.lt.s32.totalorder %s6228_s20, %s6228_s20 }
  0x1d   :  { %p5998_p11 = scmp.ne.s32.totalorder %s6228_s20, %s5997_s21  ;;  %p6003_p13 = scmp.lt.s32.totalorder %s5997_s21, %s5997_s21 }
  0x1f   :  { %p6004_p0 = por %p6003_p13, %p6002_p12 }
  0x21   :  { %p6005_p1 = pnand %p6004_p0, %p5998_p11 }
  0x23   :  { %6008 = shalt.err (!%p6005_p1)
}
  0x24   :  { %s6155_s1 = smov 128   ;;  %s6156_s18 = smov 8  }
  0x25   :  { %68 = dma.hbm_to_vmem [thread:$0]  %s6447_s4, 8192, %s6228_s20, [#allocation9], %s6155_s1, %s6155_s1, %s6156_s18  }
  0x26   :  { %s6157_s24 = smov [#allocation2]   ;;  %s6158_s26 = smov [#allocation7]  }
  0x27   :  { %s29_s25 = sshll.u32 %s6157_s24, 4  ;;  %s48_s27 = sshll.u32 %s6158_s26, 4  ;;  %s30_s25 = int_to_ptr.vmem [resolvable:$true] %s29_s25  ;;  %s6259_s27 = int_to_ptr.vmem [resolvable:$true] %s48_s27 }
  0x28   :  { %s6009_s30 = scalar_lea.hbm %s6443_s0, 896 }
  0x29   :  { %p6010_p2 = scmp.ne.s32.totalorder %s6443_s0, %s6009_s30  ;;  %p6013_p3 = scmp.lt.u32.totalorder %s6009_s30, %s6443_s0 }
  0x2b   :  { %p6015_p4 = pnand %p6013_p3, %p6010_p2 }
  0x2d   :  { %6018 = shalt.err (!%p6015_p4)
}
  0x2e   :  { %s6019_s4 = scalar_lea.vmem %s30_s25, 896  ;;  %p6024_p6 = scmp.lt.s32.totalorder %s30_s25, %s30_s25 }
  0x2f   :  { %p6020_p5 = scmp.ne.s32.totalorder %s30_s25, %s6019_s4  ;;  %p6025_p7 = scmp.lt.s32.totalorder %s6019_s4, %s6019_s4 }
  0x31   :  { %p6026_p8 = por %p6025_p7, %p6024_p6 }
  0x33   :  { %p6027_p9 = pnand %p6026_p8, %p6020_p5 }
  0x35   :  { %6030 = shalt.err (!%p6027_p9)
}
  0x36   :  { %32 = dma.hbm_to_vmem [thread:$0]  %s6443_s0, 896, %s30_s25, [#allocation3]  }
  0x37   :  { %s6031_s21 = scalar_lea.hbm %s6445_s2, 28672 }
  0x38   :  { %p6032_p10 = scmp.ne.s32.totalorder %s6445_s2, %s6031_s21  ;;  %p6035_p11 = scmp.lt.u32.totalorder %s6031_s21, %s6445_s2 }
  0x3a   :  { %p6037_p12 = pnand %p6035_p11, %p6032_p10 }
  0x3c   :  { %6040 = shalt.err (!%p6037_p12)
}
  0x3d   :  { %s6041_s24 = scalar_lea.vmem %s6259_s27, 28672  ;;  %p6046_p0 = scmp.lt.s32.totalorder %s6259_s27, %s6259_s27 }
  0x3e   :  { %p6042_p13 = scmp.ne.s32.totalorder %s6259_s27, %s6041_s24  ;;  %p6047_p1 = scmp.lt.s32.totalorder %s6041_s24, %s6041_s24 }
  0x40   :  { %p6048_p2 = por %p6047_p1, %p6046_p0 }
  0x42   :  { %p6049_p3 = pnand %p6048_p2, %p6042_p13 }
  0x44   :  { %6052 = shalt.err (!%p6049_p3)
}
  0x45   :  { %s6159_s0 = smov 256   ;;  %s6160_s25 = smov 16  }
  0x46   :  { %54 = dma.hbm_to_vmem [thread:$0]  %s6445_s2, 28672, %s6259_s27, [#allocation6], %s6159_s0, %s6159_s0, %s6160_s25  }
  0x47   :  { %s6161_s29 = smov [#allocation10]   ;;  %s6162_s12 = smov [#allocation11]  }
  0x48   :  { %s76_s30 = sshll.u32 %s6161_s29, 4  ;;  %s90_s13 = sshll.u32 %s6162_s12, 4  ;;  %s77_s30 = int_to_ptr.vmem [resolvable:$true] %s76_s30  ;;  %s6290_s13 = int_to_ptr.vmem [resolvable:$true] %s90_s13 }
  0x49   :  { %s6053_s4 = scalar_lea.hbm %s6449_s6, 4096 }
  0x4a   :  { %p6054_p4 = scmp.ne.s32.totalorder %s6449_s6, %s6053_s4  ;;  %p6057_p5 = scmp.lt.u32.totalorder %s6053_s4, %s6449_s6 }
  0x4c   :  { %p6059_p6 = pnand %p6057_p5, %p6054_p4 }
  0x4e   :  { %6062 = shalt.err (!%p6059_p6)
}
  0x4f   :  { %s6063_s2 = scalar_lea.vmem %s77_s30, 4096  ;;  %p6068_p8 = scmp.lt.s32.totalorder %s77_s30, %s77_s30 }
  0x50   :  { %p6064_p7 = scmp.ne.s32.totalorder %s77_s30, %s6063_s2  ;;  %p6069_p9 = scmp.lt.s32.totalorder %s6063_s2, %s6063_s2 }
  0x52   :  { %p6070_p10 = por %p6069_p9, %p6068_p8 }
  0x54   :  { %p6071_p11 = pnand %p6070_p10, %p6064_p7 }
  0x56   :  { %6074 = shalt.err (!%p6071_p11)
}
  0x57   :  { %82 = dma.hbm_to_vmem [thread:$0]  %s6449_s6, 4096, %s77_s30, [#allocation9], %s6159_s0, %s6159_s0, %s6160_s25  }
  0x58   :  { %s6075_s22 = scalar_lea.hbm %s6451_s8, 28672 }
  0x59   :  { %p6076_p12 = scmp.ne.s32.totalorder %s6451_s8, %s6075_s22  ;;  %p6079_p13 = scmp.lt.u32.totalorder %s6075_s22, %s6451_s8 }
  0x5b   :  { %p6081_p0 = pnand %p6079_p13, %p6076_p12 }
  0x5d   :  { %6084 = shalt.err (!%p6081_p0)
}
  0x5e   :  { %s6085_s29 = scalar_lea.vmem %s6290_s13, 28672  ;;  %p6090_p2 = scmp.lt.s32.totalorder %s6290_s13, %s6290_s13 }
  0x5f   :  { %p6086_p1 = scmp.ne.s32.totalorder %s6290_s13, %s6085_s29  ;;  %p6091_p3 = scmp.lt.s32.totalorder %s6085_s29, %s6085_s29 }
  0x61   :  { %p6092_p4 = por %p6091_p3, %p6090_p2 }
  0x63   :  { %p6093_p5 = pnand %p6092_p4, %p6086_p1 }
  0x65   :  { %6096 = shalt.err (!%p6093_p5)
}
  0x66   :  { %s6163_s6 = smov 448   ;;  %s6164_s0 = smov 28  }
  0x67   :  { %96 = dma.hbm_to_vmem [thread:$0]  %s6451_s8, 28672, %s6290_s13, [#allocation12], %s6163_s6, %s6163_s6, %s6164_s0  }
  0x68   :  { %6141 = dma.done.wait [#allocation3], 896  }
  0x69   :  { %6142 = vsyncadd [#allocation3], 4294966400 }
  0x6a   :  { %6143 = dma.done.wait [#allocation6], 28800  }
  0x6b   :  { %6144 = vsyncadd [#allocation6], 4294938496 }
  0x6c   :  { %6145 = dma.done.wait [#allocation9], 12288  }
  0x6d   :  { %6146 = vsyncadd [#allocation9], 4294955008 }
  0x6e   :  { %6147 = dma.done.wait [#allocation12], 28672  }
  0x6f   :  { %6148 = vsyncadd [#allocation12], 4294938624  ;;  %v5137_v0 = vld [vmem:[#allocation7 + $0x4] ss:$16 sps:$4 sm:$0xff]   ;;  %v5139_v1 = vld [vmem:[#allocation7 + $0xc] ss:$16 sps:$4 sm:$0xff]  }
  0x70   :  { %1498 = vmatprep.subr.bf16.mxu0 %v5137_v0  ;;  %v5141_v2 = vld [vmem:[#allocation7] ss:$16 sps:$4 sm:$0xff]   ;;  %v5142_v3 = vld [vmem:[#allocation7 + $0x8] ss:$16 sps:$4 sm:$0xff]   ;;  %1662 = vmatprep.subr.bf16.mxu1 %v5139_v1  ;;  %v5143_v4 = vld [vmem:[#allocation7 + $0x24] ss:$16 sps:$4 sm:$0xff]  }
  0x71   :  { %1499 = vmatpush1.bf16.msra.mxu0 %v5141_v2  ;;  %1663 = vmatpush1.bf16.msra.mxu1 %v5142_v3  ;;  %v5145_v5 = vld [vmem:[#allocation7 + $0x2c] ss:$16 sps:$4 sm:$0xff]   ;;  %v5147_v6 = vld [vmem:[#allocation7 + $0x20] ss:$16 sps:$4 sm:$0xff]   ;;  %v5148_v7 = vld [vmem:[#allocation7 + $0x28] ss:$16 sps:$4 sm:$0xff]  }
  0x72   :  { %1500 = vmatprep.subr.bf16.mxu0 %v5143_v4  ;;  %1664 = vmatprep.subr.bf16.mxu1 %v5145_v5  ;;  %v5149_v8 = vld [vmem:[#allocation7 + $0x44] ss:$16 sps:$4 sm:$0xff]   ;;  %v5151_v9 = vld [vmem:[#allocation7 + $0x4c] ss:$16 sps:$4 sm:$0xff]   ;;  %v5153_v10 = vld [vmem:[#allocation7 + $0x40] ss:$16 sps:$4 sm:$0xff]  }
  0x73   :  { %v5154_v11 = vld [vmem:[#allocation7 + $0x48] ss:$16 sps:$4 sm:$0xff]   ;;  %v5155_v12 = vld [vmem:[#allocation7 + $0x64] ss:$16 sps:$4 sm:$0xff]   ;;  %v5157_v13 = vld [vmem:[#allocation7 + $0x6c] ss:$16 sps:$4 sm:$0xff]  }
  0x74   :  { %v5159_v14 = vld [vmem:[#allocation7 + $0x60] ss:$16 sps:$4 sm:$0xff]   ;;  %v5160_v15 = vld [vmem:[#allocation7 + $0x68] ss:$16 sps:$4 sm:$0xff]   ;;  %v5161_v16 = vld [vmem:[#allocation7 + $0x84] ss:$16 sps:$4 sm:$0xff]  }
  0x75   :  { %1501 = vmatpush1.bf16.msra.mxu0 %v5147_v6  ;;  %1665 = vmatpush1.bf16.msra.mxu1 %v5148_v7  ;;  %v5163_v17 = vld [vmem:[#allocation7 + $0x8c] ss:$16 sps:$4 sm:$0xff]   ;;  %v5165_v18 = vld [vmem:[#allocation7 + $0x80] ss:$16 sps:$4 sm:$0xff]   ;;  %v5166_v19 = vld [vmem:[#allocation7 + $0x88] ss:$16 sps:$4 sm:$0xff]  }
  0x76   :  { %1502 = vmatprep.subr.bf16.mxu0 %v5149_v8  ;;  %1666 = vmatprep.subr.bf16.mxu1 %v5151_v9  ;;  %v5167_v20 = vld [vmem:[#allocation7 + $0xa4] ss:$16 sps:$4 sm:$0xff]   ;;  %v5169_v21 = vld [vmem:[#allocation7 + $0xac] ss:$16 sps:$4 sm:$0xff]   ;;  %v5171_v22 = vld [vmem:[#allocation7 + $0xa0] ss:$16 sps:$4 sm:$0xff]  }
  0x77   :  { %v5172_v23 = vld [vmem:[#allocation7 + $0xa8] ss:$16 sps:$4 sm:$0xff]   ;;  %v5173_v24 = vld [vmem:[#allocation7 + $0xc4] ss:$16 sps:$4 sm:$0xff]   ;;  %v5175_v25 = vld [vmem:[#allocation7 + $0xcc] ss:$16 sps:$4 sm:$0xff]  }
  0x78   :  { %v5177_v26 = vld [vmem:[#allocation7 + $0xc0] ss:$16 sps:$4 sm:$0xff]   ;;  %v5178_v27 = vld [vmem:[#allocation7 + $0xc8] ss:$16 sps:$4 sm:$0xff]   ;;  %v5179_v28 = vld [vmem:[#allocation7 + $0xe4] ss:$16 sps:$4 sm:$0xff]  }
  0x79   :  { %1503 = vmatpush1.bf16.msra.mxu0 %v5153_v10  ;;  %1667 = vmatpush1.bf16.msra.mxu1 %v5154_v11  ;;  %v5181_v29 = vld [vmem:[#allocation7 + $0xec] ss:$16 sps:$4 sm:$0xff]   ;;  %v5183_v30 = vld [vmem:[#allocation7 + $0xe0] ss:$16 sps:$4 sm:$0xff]   ;;  %v5184_v31 = vld [vmem:[#allocation7 + $0xe8] ss:$16 sps:$4 sm:$0xff]  }
  0x7a   :  { %1504 = vmatprep.subr.bf16.mxu0 %v5155_v12  ;;  %1668 = vmatprep.subr.bf16.mxu1 %v5157_v13  ;;  %v5185_v32 = vld [vmem:[#allocation7 + $0x104] ss:$16 sps:$4 sm:$0xff]   ;;  %v5187_v33 = vld [vmem:[#allocation7 + $0x10c] ss:$16 sps:$4 sm:$0xff]   ;;  %v5189_v34 = vld [vmem:[#allocation7 + $0x100] ss:$16 sps:$4 sm:$0xff]  }
  0x7b   :  { %v5190_v35 = vld [vmem:[#allocation7 + $0x108] ss:$16 sps:$4 sm:$0xff]   ;;  %v5191_v36 = vld [vmem:[#allocation7 + $0x124] ss:$16 sps:$4 sm:$0xff]   ;;  %v5193_v37 = vld [vmem:[#allocation7 + $0x12c] ss:$16 sps:$4 sm:$0xff]  }
  0x7c   :  { %v5195_v38 = vld [vmem:[#allocation7 + $0x120] ss:$16 sps:$4 sm:$0xff]   ;;  %v5196_v39 = vld [vmem:[#allocation7 + $0x128] ss:$16 sps:$4 sm:$0xff]   ;;  %v5197_v40 = vld [vmem:[#allocation7 + $0x144] ss:$16 sps:$4 sm:$0xff]  }
  0x7d   :  { %1505 = vmatpush1.bf16.msra.mxu0 %v5159_v14  ;;  %1669 = vmatpush1.bf16.msra.mxu1 %v5160_v15  ;;  %v5199_v41 = vld [vmem:[#allocation7 + $0x14c] ss:$16 sps:$4 sm:$0xff]   ;;  %v5201_v42 = vld [vmem:[#allocation7 + $0x140] ss:$16 sps:$4 sm:$0xff]   ;;  %v5202_v43 = vld [vmem:[#allocation7 + $0x148] ss:$16 sps:$4 sm:$0xff]  }
  0x7e   :  { %1506 = vmatprep.subr.bf16.mxu0 %v5161_v16  ;;  %1670 = vmatprep.subr.bf16.mxu1 %v5163_v17  ;;  %v5203_v44 = vld [vmem:[#allocation7 + $0x164] ss:$16 sps:$4 sm:$0xff]   ;;  %v5205_v45 = vld [vmem:[#allocation7 + $0x16c] ss:$16 sps:$4 sm:$0xff]   ;;  %v5207_v47 = vld [vmem:[#allocation7 + $0x160] ss:$16 sps:$4 sm:$0xff]  }
  0x7f   :  { %v119_v46 = vld [vmem:[#allocation2 + $0x8] sm:$0xff]  ;;  %v5209_v50 = vld [vmem:[#allocation7 + $0x184] ss:$16 sps:$4 sm:$0xff]   ;;  %v5213_v52 = vld [vmem:[#allocation7 + $0x180] ss:$16 sps:$4 sm:$0xff]  }
  0x80   :  { %v126_v48 = vpack.c.bf16 %v119_v46, %v119_v46  ;;  %v5208_v49 = vld [vmem:[#allocation7 + $0x168] ss:$16 sps:$4 sm:$0xff]   ;;  %v5211_v51 = vld [vmem:[#allocation7 + $0x18c] ss:$16 sps:$4 sm:$0xff]   ;;  %v5215_v54 = vld [vmem:[#allocation7 + $0x1a4] ss:$16 sps:$4 sm:$0xff]  }
  0x81   :  { %1507 = vmatpush1.bf16.msra.mxu0 %v5165_v18  ;;  %1671 = vmatpush1.bf16.msra.mxu1 %v5166_v19  ;;  %v5214_v53 = vld [vmem:[#allocation7 + $0x188] ss:$16 sps:$4 sm:$0xff]   ;;  %v5217_v55 = vld [vmem:[#allocation7 + $0x1ac] ss:$16 sps:$4 sm:$0xff]   ;;  %v5219_v56 = vld [vmem:[#allocation7 + $0x1a0] ss:$16 sps:$4 sm:$0xff]  }
  0x82   :  { %1508 = vmatprep.subr.bf16.mxu0 %v5167_v20  ;;  %1672 = vmatprep.subr.bf16.mxu1 %v5169_v21  ;;  %v5220_v57 = vld [vmem:[#allocation7 + $0x1a8] ss:$16 sps:$4 sm:$0xff]   ;;  %v5221_v58 = vld [vmem:[#allocation7 + $0x1c4] ss:$16 sps:$4 sm:$0xff]   ;;  %v5223_v59 = vld [vmem:[#allocation7 + $0x1cc] ss:$16 sps:$4 sm:$0xff]  }
  0x83   :  { %1530 = vmatprep.mubr.bf16.mxu0 %v126_v48  ;;  %1694 = vmatprep.mubr.bf16.mxu1 %v126_v48  ;;  %v5225_v60 = vld [vmem:[#allocation7 + $0x1c0] ss:$16 sps:$4 sm:$0xff]   ;;  %v5226_v61 = vld [vmem:[#allocation7 + $0x1c8] ss:$16 sps:$4 sm:$0xff]   ;;  %v5227_v62 = vld [vmem:[#allocation7 + $0x1e4] ss:$16 sps:$4 sm:$0xff]  }
  0x84   :  { %v5229_v63 = vld [vmem:[#allocation7 + $0x1ec] ss:$16 sps:$4 sm:$0xff]   ;;  %v5231_v0 = vld [vmem:[#allocation7 + $0x1e0] ss:$16 sps:$4 sm:$0xff]   ;;  %v5232_v1 = vld [vmem:[#allocation7 + $0x1e8] ss:$16 sps:$4 sm:$0xff]  }
  0x85   :  { %1509 = vmatpush1.bf16.msra.mxu0 %v5171_v22  ;;  %1673 = vmatpush1.bf16.msra.mxu1 %v5172_v23  ;;  %v118_v2 = vld [vmem:[#allocation2] sm:$0xff]  ;;  %v5238_v4 = vld [vmem:[#allocation7 + $0x20c] ss:$16 sps:$4 sm:$0xff]   ;;  %v5236_v7 = vld [vmem:[#allocation7 + $0x208] ss:$16 sps:$4 sm:$0xff]  }
  0x86   :  { %1510 = vmatprep.subr.bf16.mxu0 %v5173_v24  ;;  %1674 = vmatprep.subr.bf16.mxu1 %v5175_v25  ;;  %v5235_v3 = vld [vmem:[#allocation7 + $0x204] ss:$16 sps:$4 sm:$0xff]   ;;  %v125_v5 = vpack.c.bf16 %v118_v2, %v118_v2  ;;  %v5233_v6 = vld [vmem:[#allocation7 + $0x200] ss:$16 sps:$4 sm:$0xff]   ;;  %v5244_v9 = vld [vmem:[#allocation7 + $0x22c] ss:$16 sps:$4 sm:$0xff]  }
  0x87   :  { %v5241_v8 = vld [vmem:[#allocation7 + $0x224] ss:$16 sps:$4 sm:$0xff]   ;;  %v5239_v10 = vld [vmem:[#allocation7 + $0x220] ss:$16 sps:$4 sm:$0xff]   ;;  %v5242_v11 = vld [vmem:[#allocation7 + $0x228] ss:$16 sps:$4 sm:$0xff]  }
  0x88   :  { %v5247_v12 = vld [vmem:[#allocation7 + $0x244] ss:$16 sps:$4 sm:$0xff]   ;;  %v5250_v13 = vld [vmem:[#allocation7 + $0x24c] ss:$16 sps:$4 sm:$0xff]   ;;  %v5245_v14 = vld [vmem:[#allocation7 + $0x240] ss:$16 sps:$4 sm:$0xff]  }
  0x89   :  { %1511 = vmatpush1.bf16.msra.mxu0 %v5177_v26  ;;  %1675 = vmatpush1.bf16.msra.mxu1 %v5178_v27  ;;  %v5248_v15 = vld [vmem:[#allocation7 + $0x248] ss:$16 sps:$4 sm:$0xff]   ;;  %v5253_v16 = vld [vmem:[#allocation7 + $0x264] ss:$16 sps:$4 sm:$0xff]   ;;  %v5256_v17 = vld [vmem:[#allocation7 + $0x26c] ss:$16 sps:$4 sm:$0xff]  }
  0x8a   :  { %1512 = vmatprep.subr.bf16.mxu0 %v5179_v28  ;;  %1676 = vmatprep.subr.bf16.mxu1 %v5181_v29  ;;  %v5251_v18 = vld [vmem:[#allocation7 + $0x260] ss:$16 sps:$4 sm:$0xff]   ;;  %v5254_v19 = vld [vmem:[#allocation7 + $0x268] ss:$16 sps:$4 sm:$0xff]   ;;  %v5259_v20 = vld [vmem:[#allocation7 + $0x284] ss:$16 sps:$4 sm:$0xff]  }
  0x8b   :  { %v5262_v21 = vld [vmem:[#allocation7 + $0x28c] ss:$16 sps:$4 sm:$0xff]   ;;  %v5257_v22 = vld [vmem:[#allocation7 + $0x280] ss:$16 sps:$4 sm:$0xff]   ;;  %v5260_v23 = vld [vmem:[#allocation7 + $0x288] ss:$16 sps:$4 sm:$0xff]  }
  0x8c   :  { %v5265_v24 = vld [vmem:[#allocation7 + $0x2a4] ss:$16 sps:$4 sm:$0xff]   ;;  %v5268_v25 = vld [vmem:[#allocation7 + $0x2ac] ss:$16 sps:$4 sm:$0xff]   ;;  %v5263_v26 = vld [vmem:[#allocation7 + $0x2a0] ss:$16 sps:$4 sm:$0xff]  }
  0x8d   :  { %1513 = vmatpush1.bf16.msra.mxu0 %v5183_v30  ;;  %1677 = vmatpush1.bf16.msra.mxu1 %v5184_v31  ;;  %v5266_v27 = vld [vmem:[#allocation7 + $0x2a8] ss:$16 sps:$4 sm:$0xff]   ;;  %v5271_v28 = vld [vmem:[#allocation7 + $0x2c4] ss:$16 sps:$4 sm:$0xff]   ;;  %v5274_v29 = vld [vmem:[#allocation7 + $0x2cc] ss:$16 sps:$4 sm:$0xff]  }
  0x8e   :  { %1514 = vmatprep.subr.bf16.mxu0 %v5185_v32  ;;  %1678 = vmatprep.subr.bf16.mxu1 %v5187_v33  ;;  %v121_v30 = vld [vmem:[#allocation2 + $0x18] sm:$0xff]  ;;  %v5269_v31 = vld [vmem:[#allocation7 + $0x2c0] ss:$16 sps:$4 sm:$0xff]   ;;  %v5295_v46 = vld [vmem:[#allocation7 + $0x344] ss:$16 sps:$4 sm:$0xff]  }
  0x8f   :  { %v128_v32 = vpack.c.bf16 %v121_v30, %v121_v30  ;;  %v5272_v33 = vld [vmem:[#allocation7 + $0x2c8] ss:$16 sps:$4 sm:$0xff]   ;;  %v5293_v48 = vld [vmem:[#allocation7 + $0x340] ss:$16 sps:$4 sm:$0xff]   ;;  %v5325_v2 = vld [vmem:[#allocation7 + $0x3e4] ss:$16 sps:$4 sm:$0xff]  }
  0x90   :  { %v5361_v30 = vld [vmem:[#allocation7 + $0x4a4] ss:$16 sps:$4 sm:$0xff]  }
  0x91   :  { %1515 = vmatpush1.bf16.msra.mxu0 %v5189_v34  ;;  %1679 = vmatpush1.bf16.msra.mxu1 %v5190_v35  ;;  %v5277_v34 = vld [vmem:[#allocation7 + $0x2e4] ss:$16 sps:$4 sm:$0xff]   ;;  %v5280_v35 = vld [vmem:[#allocation7 + $0x2ec] ss:$16 sps:$4 sm:$0xff]  }
  0x92   :  { %1516 = vmatprep.subr.bf16.mxu0 %v5191_v36  ;;  %1680 = vmatprep.subr.bf16.mxu1 %v5193_v37  ;;  %v5275_v36 = vld [vmem:[#allocation7 + $0x2e0] ss:$16 sps:$4 sm:$0xff]   ;;  %v5278_v37 = vld [vmem:[#allocation7 + $0x2e8] ss:$16 sps:$4 sm:$0xff]  }
  0x95   :  { %1517 = vmatpush1.bf16.msra.mxu0 %v5195_v38  ;;  %1681 = vmatpush1.bf16.msra.mxu1 %v5196_v39  ;;  %v5283_v38 = vld [vmem:[#allocation7 + $0x304] ss:$16 sps:$4 sm:$0xff]   ;;  %v5286_v39 = vld [vmem:[#allocation7 + $0x30c] ss:$16 sps:$4 sm:$0xff]  }
  0x96   :  { %1518 = vmatprep.subr.bf16.mxu0 %v5197_v40  ;;  %1682 = vmatprep.subr.bf16.mxu1 %v5199_v41  ;;  %v5281_v40 = vld [vmem:[#allocation7 + $0x300] ss:$16 sps:$4 sm:$0xff]   ;;  %v5284_v41 = vld [vmem:[#allocation7 + $0x308] ss:$16 sps:$4 sm:$0xff]  }
  0x99   :  { %1519 = vmatpush1.bf16.msra.mxu0 %v5201_v42  ;;  %1683 = vmatpush1.bf16.msra.mxu1 %v5202_v43  ;;  %v5289_v42 = vld [vmem:[#allocation7 + $0x324] ss:$16 sps:$4 sm:$0xff]   ;;  %v5292_v43 = vld [vmem:[#allocation7 + $0x32c] ss:$16 sps:$4 sm:$0xff]  }
  0x9a   :  { %1520 = vmatprep.subr.bf16.mxu0 %v5203_v44  ;;  %1684 = vmatprep.subr.bf16.mxu1 %v5205_v45  ;;  %v5287_v44 = vld [vmem:[#allocation7 + $0x320] ss:$16 sps:$4 sm:$0xff]   ;;  %v5290_v45 = vld [vmem:[#allocation7 + $0x328] ss:$16 sps:$4 sm:$0xff]  }
  0x9d   :  { %1521 = vmatpush1.bf16.msra.mxu0 %v5207_v47  ;;  %1685 = vmatpush1.bf16.msra.mxu1 %v5208_v49  ;;  %v5298_v47 = vld [vmem:[#allocation7 + $0x34c] ss:$16 sps:$4 sm:$0xff]   ;;  %v5296_v49 = vld [vmem:[#allocation7 + $0x348] ss:$16 sps:$4 sm:$0xff]  }
  0x9e   :  { %1522 = vmatprep.subr.bf16.mxu0 %v5209_v50  ;;  %1686 = vmatprep.subr.bf16.mxu1 %v5211_v51  ;;  %v5301_v50 = vld [vmem:[#allocation7 + $0x364] ss:$16 sps:$4 sm:$0xff]   ;;  %v5304_v51 = vld [vmem:[#allocation7 + $0x36c] ss:$16 sps:$4 sm:$0xff]  }
  0xa1   :  { %1523 = vmatpush1.bf16.msra.mxu0 %v5213_v52  ;;  %1687 = vmatpush1.bf16.msra.mxu1 %v5214_v53  ;;  %v5299_v52 = vld [vmem:[#allocation7 + $0x360] ss:$16 sps:$4 sm:$0xff]   ;;  %v5302_v53 = vld [vmem:[#allocation7 + $0x368] ss:$16 sps:$4 sm:$0xff]  }
  0xa2   :  { %1524 = vmatprep.subr.bf16.mxu0 %v5215_v54  ;;  %1688 = vmatprep.subr.bf16.mxu1 %v5217_v55  ;;  %v5307_v54 = vld [vmem:[#allocation7 + $0x384] ss:$16 sps:$4 sm:$0xff]   ;;  %v5310_v55 = vld [vmem:[#allocation7 + $0x38c] ss:$16 sps:$4 sm:$0xff]  }
  0xa5   :  { %1525 = vmatpush1.bf16.msra.mxu0 %v5219_v56  ;;  %1689 = vmatpush1.bf16.msra.mxu1 %v5220_v57  ;;  %v5305_v56 = vld [vmem:[#allocation7 + $0x380] ss:$16 sps:$4 sm:$0xff]   ;;  %v5308_v57 = vld [vmem:[#allocation7 + $0x388] ss:$16 sps:$4 sm:$0xff]  }
  0xa6   :  { %1526 = vmatprep.subr.bf16.mxu0 %v5221_v58  ;;  %1690 = vmatprep.subr.bf16.mxu1 %v5223_v59  ;;  %v5313_v58 = vld [vmem:[#allocation7 + $0x3a4] ss:$16 sps:$4 sm:$0xff]   ;;  %v5316_v59 = vld [vmem:[#allocation7 + $0x3ac] ss:$16 sps:$4 sm:$0xff]  }
  0xa9   :  { %1527 = vmatpush1.bf16.msra.mxu0 %v5225_v60  ;;  %1691 = vmatpush1.bf16.msra.mxu1 %v5226_v61  ;;  %v5311_v60 = vld [vmem:[#allocation7 + $0x3a0] ss:$16 sps:$4 sm:$0xff]   ;;  %v5314_v61 = vld [vmem:[#allocation7 + $0x3a8] ss:$16 sps:$4 sm:$0xff]  }
  0xaa   :  { %1528 = vmatprep.subr.bf16.mxu0 %v5227_v62  ;;  %1692 = vmatprep.subr.bf16.mxu1 %v5229_v63  ;;  %v5319_v62 = vld [vmem:[#allocation7 + $0x3c4] ss:$16 sps:$4 sm:$0xff]   ;;  %v5322_v63 = vld [vmem:[#allocation7 + $0x3cc] ss:$16 sps:$4 sm:$0xff]  }
  0xad   :  { %1529 = vmatpush1.bf16.msra.mxu0 %v5231_v0  ;;  %1693 = vmatpush1.bf16.msra.mxu1 %v5232_v1  ;;  %v5317_v0 = vld [vmem:[#allocation7 + $0x3c0] ss:$16 sps:$4 sm:$0xff]   ;;  %v5320_v1 = vld [vmem:[#allocation7 + $0x3c8] ss:$16 sps:$4 sm:$0xff]  }
  0xae   :  { %1539 = vmatprep.subr.bf16.mxu0 %v5235_v3  ;;  %1703 = vmatprep.subr.bf16.mxu1 %v5238_v4  ;;  %v5328_v3 = vld [vmem:[#allocation7 + $0x3ec] ss:$16 sps:$4 sm:$0xff]   ;;  %v5323_v4 = vld [vmem:[#allocation7 + $0x3e0] ss:$16 sps:$4 sm:$0xff]  }
  0xb0   :  { %1531 = vmatmul.mubr.bf16.vlgmr.msra.gmra.mrb[0].mxu0 %v125_v5  ;;  %1695 = vmatmul.mubr.bf16.vlgmr.msra.gmra.mrb[0].mxu1 %v125_v5  ;;  %v5326_v5 = vld [vmem:[#allocation7 + $0x3e8] ss:$16 sps:$4 sm:$0xff]  }
  0xb1   :  { %1540 = vmatpush1.bf16.msra.mxu0 %v5233_v6  ;;  %1704 = vmatpush1.bf16.msra.mxu1 %v5236_v7  ;;  %v5331_v6 = vld [vmem:[#allocation7 + $0x404] ss:$16 sps:$4 sm:$0xff]  }
  0xb2   :  { %1541 = vmatprep.subr.bf16.mxu0 %v5241_v8  ;;  %1705 = vmatprep.subr.bf16.mxu1 %v5244_v9  ;;  %v120_v7 = vld [vmem:[#allocation2 + $0x10] sm:$0xff]  ;;  %v5334_v8 = vld [vmem:[#allocation7 + $0x40c] ss:$16 sps:$4 sm:$0xff]  }
  0xb3   :  { %1571 = vmatprep.mubr.bf16.mxu0 %v128_v32  ;;  %1735 = vmatprep.mubr.bf16.mxu1 %v128_v32  ;;  %v5329_v9 = vld [vmem:[#allocation7 + $0x400] ss:$16 sps:$4 sm:$0xff]  }
  0xb4   :  { %v5359_v32 = vld [vmem:[#allocation7 + $0x4a0] ss:$16 sps:$4 sm:$0xff]  }
  0xb5   :  { %1542 = vmatpush1.bf16.msra.mxu0 %v5239_v10  ;;  %1706 = vmatpush1.bf16.msra.mxu1 %v5242_v11  ;;  %v5332_v10 = vld [vmem:[#allocation7 + $0x408] ss:$16 sps:$4 sm:$0xff]   ;;  %v127_v11 = vpack.c.bf16 %v120_v7, %v120_v7  ;;  %v5424_v7 = vld [vmem:[#allocation7 + $0x5ec] ss:$16 sps:$4 sm:$0xff]  }
  0xb6   :  { %1543 = vmatprep.subr.bf16.mxu0 %v5247_v12  ;;  %1707 = vmatprep.subr.bf16.mxu1 %v5250_v13  ;;  %v5337_v12 = vld [vmem:[#allocation7 + $0x424] ss:$16 sps:$4 sm:$0xff]   ;;  %v5340_v13 = vld [vmem:[#allocation7 + $0x42c] ss:$16 sps:$4 sm:$0xff]  }
  0xb9   :  { %1544 = vmatpush1.bf16.msra.mxu0 %v5245_v14  ;;  %1708 = vmatpush1.bf16.msra.mxu1 %v5248_v15  ;;  %v123_v14 = vld [vmem:[#allocation2 + $0x28] sm:$0xff] }
  0xba   :  { %1545 = vmatprep.subr.bf16.mxu0 %v5253_v16  ;;  %1709 = vmatprep.subr.bf16.mxu1 %v5256_v17  ;;  %v130_v15 = vpack.c.bf16 %v123_v14, %v123_v14  ;;  %v5335_v16 = vld [vmem:[#allocation7 + $0x420] ss:$16 sps:$4 sm:$0xff]   ;;  %v5338_v17 = vld [vmem:[#allocation7 + $0x428] ss:$16 sps:$4 sm:$0xff]  }
  0xbb   :  { %v5428_v14 = vld [vmem:[#allocation7 + $0x608] ss:$16 sps:$4 sm:$0xff]  }
  0xbd   :  { %1546 = vmatpush1.bf16.msra.mxu0 %v5251_v18  ;;  %1710 = vmatpush1.bf16.msra.mxu1 %v5254_v19  ;;  %v5343_v18 = vld [vmem:[#allocation7 + $0x444] ss:$16 sps:$4 sm:$0xff]   ;;  %v5346_v19 = vld [vmem:[#allocation7 + $0x44c] ss:$16 sps:$4 sm:$0xff]  }
  0xbe   :  { %1547 = vmatprep.subr.bf16.mxu0 %v5259_v20  ;;  %1711 = vmatprep.subr.bf16.mxu1 %v5262_v21  ;;  %v5341_v20 = vld [vmem:[#allocation7 + $0x440] ss:$16 sps:$4 sm:$0xff]   ;;  %v5344_v21 = vld [vmem:[#allocation7 + $0x448] ss:$16 sps:$4 sm:$0xff]  }
  0xc1   :  { %1548 = vmatpush1.bf16.msra.mxu0 %v5257_v22  ;;  %1712 = vmatpush1.bf16.msra.mxu1 %v5260_v23  ;;  %v5349_v22 = vld [vmem:[#allocation7 + $0x464] ss:$16 sps:$4 sm:$0xff]   ;;  %v5352_v23 = vld [vmem:[#allocation7 + $0x46c] ss:$16 sps:$4 sm:$0xff]  }
  0xc2   :  { %1549 = vmatprep.subr.bf16.mxu0 %v5265_v24  ;;  %1713 = vmatprep.subr.bf16.mxu1 %v5268_v25  ;;  %v5347_v24 = vld [vmem:[#allocation7 + $0x460] ss:$16 sps:$4 sm:$0xff]   ;;  %v5350_v25 = vld [vmem:[#allocation7 + $0x468] ss:$16 sps:$4 sm:$0xff]  }
  0xc5   :  { %1550 = vmatpush1.bf16.msra.mxu0 %v5263_v26  ;;  %1714 = vmatpush1.bf16.msra.mxu1 %v5266_v27  ;;  %v5355_v26 = vld [vmem:[#allocation7 + $0x484] ss:$16 sps:$4 sm:$0xff]   ;;  %v5358_v27 = vld [vmem:[#allocation7 + $0x48c] ss:$16 sps:$4 sm:$0xff]  }
  0xc6   :  { %1551 = vmatprep.subr.bf16.mxu0 %v5271_v28  ;;  %1715 = vmatprep.subr.bf16.mxu1 %v5274_v29  ;;  %v5353_v28 = vld [vmem:[#allocation7 + $0x480] ss:$16 sps:$4 sm:$0xff]   ;;  %v5356_v29 = vld [vmem:[#allocation7 + $0x488] ss:$16 sps:$4 sm:$0xff]  }
  0xc9   :  { %1552 = vmatpush1.bf16.msra.mxu0 %v5269_v31  ;;  %1716 = vmatpush1.bf16.msra.mxu1 %v5272_v33  ;;  %v5364_v31 = vld [vmem:[#allocation7 + $0x4ac] ss:$16 sps:$4 sm:$0xff]   ;;  %v5362_v33 = vld [vmem:[#allocation7 + $0x4a8] ss:$16 sps:$4 sm:$0xff]  }
  0xca   :  { %1553 = vmatprep.subr.bf16.mxu0 %v5277_v34  ;;  %1717 = vmatprep.subr.bf16.mxu1 %v5280_v35  ;;  %v5367_v34 = vld [vmem:[#allocation7 + $0x4c4] ss:$16 sps:$4 sm:$0xff]   ;;  %v5370_v35 = vld [vmem:[#allocation7 + $0x4cc] ss:$16 sps:$4 sm:$0xff]  }
  0xcd   :  { %1554 = vmatpush1.bf16.msra.mxu0 %v5275_v36  ;;  %1718 = vmatpush1.bf16.msra.mxu1 %v5278_v37  ;;  %v5365_v36 = vld [vmem:[#allocation7 + $0x4c0] ss:$16 sps:$4 sm:$0xff]   ;;  %v5368_v37 = vld [vmem:[#allocation7 + $0x4c8] ss:$16 sps:$4 sm:$0xff]  }
  0xce   :  { %1555 = vmatprep.subr.bf16.mxu0 %v5283_v38  ;;  %1719 = vmatprep.subr.bf16.mxu1 %v5286_v39  ;;  %v5373_v38 = vld [vmem:[#allocation7 + $0x4e4] ss:$16 sps:$4 sm:$0xff]   ;;  %v5376_v39 = vld [vmem:[#allocation7 + $0x4ec] ss:$16 sps:$4 sm:$0xff]  }
  0xd1   :  { %1556 = vmatpush1.bf16.msra.mxu0 %v5281_v40  ;;  %1720 = vmatpush1.bf16.msra.mxu1 %v5284_v41  ;;  %v5371_v40 = vld [vmem:[#allocation7 + $0x4e0] ss:$16 sps:$4 sm:$0xff]   ;;  %v5374_v41 = vld [vmem:[#allocation7 + $0x4e8] ss:$16 sps:$4 sm:$0xff]  }
  0xd2   :  { %1557 = vmatprep.subr.bf16.mxu0 %v5289_v42  ;;  %1721 = vmatprep.subr.bf16.mxu1 %v5292_v43  ;;  %v5379_v42 = vld [vmem:[#allocation7 + $0x504] ss:$16 sps:$4 sm:$0xff]   ;;  %v5382_v43 = vld [vmem:[#allocation7 + $0x50c] ss:$16 sps:$4 sm:$0xff]  }
  0xd5   :  { %1558 = vmatpush1.bf16.msra.mxu0 %v5287_v44  ;;  %1722 = vmatpush1.bf16.msra.mxu1 %v5290_v45  ;;  %v5377_v44 = vld [vmem:[#allocation7 + $0x500] ss:$16 sps:$4 sm:$0xff]   ;;  %v5380_v45 = vld [vmem:[#allocation7 + $0x508] ss:$16 sps:$4 sm:$0xff]  }
  0xd6   :  { %1559 = vmatprep.subr.bf16.mxu0 %v5295_v46  ;;  %1723 = vmatprep.subr.bf16.mxu1 %v5298_v47  ;;  %v5385_v46 = vld [vmem:[#allocation7 + $0x524] ss:$16 sps:$4 sm:$0xff]   ;;  %v5388_v47 = vld [vmem:[#allocation7 + $0x52c] ss:$16 sps:$4 sm:$0xff]  }
  0xd9   :  { %1560 = vmatpush1.bf16.msra.mxu0 %v5293_v48  ;;  %1724 = vmatpush1.bf16.msra.mxu1 %v5296_v49  ;;  %v5383_v48 = vld [vmem:[#allocation7 + $0x520] ss:$16 sps:$4 sm:$0xff]   ;;  %v5386_v49 = vld [vmem:[#allocation7 + $0x528] ss:$16 sps:$4 sm:$0xff]  }
  0xda   :  { %1561 = vmatprep.subr.bf16.mxu0 %v5301_v50  ;;  %1725 = vmatprep.subr.bf16.mxu1 %v5304_v51  ;;  %v5391_v50 = vld [vmem:[#allocation7 + $0x544] ss:$16 sps:$4 sm:$0xff]   ;;  %v5394_v51 = vld [vmem:[#allocation7 + $0x54c] ss:$16 sps:$4 sm:$0xff]  }
  0xdd   :  { %1562 = vmatpush1.bf16.msra.mxu0 %v5299_v52  ;;  %1726 = vmatpush1.bf16.msra.mxu1 %v5302_v53  ;;  %v5389_v52 = vld [vmem:[#allocation7 + $0x540] ss:$16 sps:$4 sm:$0xff]   ;;  %v5392_v53 = vld [vmem:[#allocation7 + $0x548] ss:$16 sps:$4 sm:$0xff]  }
  0xde   :  { %1563 = vmatprep.subr.bf16.mxu0 %v5307_v54  ;;  %1727 = vmatprep.subr.bf16.mxu1 %v5310_v55  ;;  %v5397_v54 = vld [vmem:[#allocation7 + $0x564] ss:$16 sps:$4 sm:$0xff]   ;;  %v5400_v55 = vld [vmem:[#allocation7 + $0x56c] ss:$16 sps:$4 sm:$0xff]  }
  0xe1   :  { %1564 = vmatpush1.bf16.msra.mxu0 %v5305_v56  ;;  %1728 = vmatpush1.bf16.msra.mxu1 %v5308_v57  ;;  %v5395_v56 = vld [vmem:[#allocation7 + $0x560] ss:$16 sps:$4 sm:$0xff]   ;;  %v5398_v57 = vld [vmem:[#allocation7 + $0x568] ss:$16 sps:$4 sm:$0xff]  }
  0xe2   :  { %1565 = vmatprep.subr.bf16.mxu0 %v5313_v58  ;;  %1729 = vmatprep.subr.bf16.mxu1 %v5316_v59  ;;  %v5403_v58 = vld [vmem:[#allocation7 + $0x584] ss:$16 sps:$4 sm:$0xff]   ;;  %v5406_v59 = vld [vmem:[#allocation7 + $0x58c] ss:$16 sps:$4 sm:$0xff]  }
  0xe5   :  { %1566 = vmatpush1.bf16.msra.mxu0 %v5311_v60  ;;  %1730 = vmatpush1.bf16.msra.mxu1 %v5314_v61  ;;  %v5401_v60 = vld [vmem:[#allocation7 + $0x580] ss:$16 sps:$4 sm:$0xff]   ;;  %v5404_v61 = vld [vmem:[#allocation7 + $0x588] ss:$16 sps:$4 sm:$0xff]  }
  0xe6   :  { %1567 = vmatprep.subr.bf16.mxu0 %v5319_v62  ;;  %1731 = vmatprep.subr.bf16.mxu1 %v5322_v63  ;;  %v5409_v62 = vld [vmem:[#allocation7 + $0x5a4] ss:$16 sps:$4 sm:$0xff]   ;;  %v5412_v63 = vld [vmem:[#allocation7 + $0x5ac] ss:$16 sps:$4 sm:$0xff]  }
  0xe9   :  { %1568 = vmatpush1.bf16.msra.mxu0 %v5317_v0  ;;  %1732 = vmatpush1.bf16.msra.mxu1 %v5320_v1  ;;  %v5407_v0 = vld [vmem:[#allocation7 + $0x5a0] ss:$16 sps:$4 sm:$0xff]   ;;  %v5410_v1 = vld [vmem:[#allocation7 + $0x5a8] ss:$16 sps:$4 sm:$0xff]  }
  0xea   :  { %1569 = vmatprep.subr.bf16.mxu0 %v5325_v2  ;;  %1733 = vmatprep.subr.bf16.mxu1 %v5328_v3  ;;  %v5415_v2 = vld [vmem:[#allocation7 + $0x5c4] ss:$16 sps:$4 sm:$0xff]   ;;  %v5418_v3 = vld [vmem:[#allocation7 + $0x5cc] ss:$16 sps:$4 sm:$0xff]  }
  0xed   :  { %1570 = vmatpush1.bf16.msra.mxu0 %v5323_v4  ;;  %1734 = vmatpush1.bf16.msra.mxu1 %v5326_v5  ;;  %v5413_v4 = vld [vmem:[#allocation7 + $0x5c0] ss:$16 sps:$4 sm:$0xff]   ;;  %v5416_v5 = vld [vmem:[#allocation7 + $0x5c8] ss:$16 sps:$4 sm:$0xff]  }
  0xee   :  { %1580 = vmatprep.subr.bf16.mxu0 %v5331_v6  ;;  %1744 = vmatprep.subr.bf16.mxu1 %v5334_v8  ;;  %v5421_v6 = vld [vmem:[#allocation7 + $0x5e4] ss:$16 sps:$4 sm:$0xff]   ;;  %v5419_v8 = vld [vmem:[#allocation7 + $0x5e0] ss:$16 sps:$4 sm:$0xff]  }
  0xf0   :  { %1572 = vmatmul.mubr.bf16.vlgmr.msra.gmra.mrb[0].mxu0 %v127_v11  ;;  %1736 = vmatmul.mubr.bf16.vlgmr.msra.gmra.mrb[0].mxu1 %v127_v11  ;;  %v5427_v11 = vld [vmem:[#allocation7 + $0x604] ss:$16 sps:$4 sm:$0xff]  }
  0xf1   :  { %1581 = vmatpush1.bf16.msra.mxu0 %v5329_v9  ;;  %1745 = vmatpush1.bf16.msra.mxu1 %v5332_v10  ;;  %v5422_v9 = vld [vmem:[#allocation7 + $0x5e8] ss:$16 sps:$4 sm:$0xff]   ;;  %v122_v10 = vld [vmem:[#allocation2 + $0x20] sm:$0xff] }
  0xf2   :  { %1582 = vmatprep.subr.bf16.mxu0 %v5337_v12  ;;  %1746 = vmatprep.subr.bf16.mxu1 %v5340_v13  ;;  %v5430_v12 = vld [vmem:[#allocation7 + $0x60c] ss:$16 sps:$4 sm:$0xff]   ;;  %v5425_v13 = vld [vmem:[#allocation7 + $0x600] ss:$16 sps:$4 sm:$0xff]  }
  0xf3   :  { %1612 = vmatprep.mubr.bf16.mxu0 %v130_v15  ;;  %1776 = vmatprep.mubr.bf16.mxu1 %v130_v15  ;;  %v129_v15 = vpack.c.bf16 %v122_v10, %v122_v10  ;;  %v5512_v10 = vld [vmem:[#allocation8 + $0xd0] ss:$8 sps:$4 sm:$0xff]  }
  0xf5   :  { %1583 = vmatpush1.bf16.msra.mxu0 %v5335_v16  ;;  %1747 = vmatpush1.bf16.msra.mxu1 %v5338_v17  ;;  %v5433_v16 = vld [vmem:[#allocation7 + $0x624] ss:$16 sps:$4 sm:$0xff]   ;;  %v5436_v17 = vld [vmem:[#allocation7 + $0x62c] ss:$16 sps:$4 sm:$0xff]  }
  0xf6   :  { %1584 = vmatprep.subr.bf16.mxu0 %v5343_v18  ;;  %1748 = vmatprep.subr.bf16.mxu1 %v5346_v19  ;;  %v5431_v18 = vld [vmem:[#allocation7 + $0x620] ss:$16 sps:$4 sm:$0xff]   ;;  %v5434_v19 = vld [vmem:[#allocation7 + $0x628] ss:$16 sps:$4 sm:$0xff]  }
  0xf9   :  { %1585 = vmatpush1.bf16.msra.mxu0 %v5341_v20  ;;  %1749 = vmatpush1.bf16.msra.mxu1 %v5344_v21  ;;  %v5439_v20 = vld [vmem:[#allocation7 + $0x644] ss:$16 sps:$4 sm:$0xff]   ;;  %v5442_v21 = vld [vmem:[#allocation7 + $0x64c] ss:$16 sps:$4 sm:$0xff]  }
  0xfa   :  { %1586 = vmatprep.subr.bf16.mxu0 %v5349_v22  ;;  %1750 = vmatprep.subr.bf16.mxu1 %v5352_v23  ;;  %v5437_v22 = vld [vmem:[#allocation7 + $0x640] ss:$16 sps:$4 sm:$0xff]   ;;  %v5440_v23 = vld [vmem:[#allocation7 + $0x648] ss:$16 sps:$4 sm:$0xff]  }
  0xfd   :  { %1587 = vmatpush1.bf16.msra.mxu0 %v5347_v24  ;;  %1751 = vmatpush1.bf16.msra.mxu1 %v5350_v25  ;;  %v6165_v24 = vmov 0   ;;  %v5445_v25 = vld [vmem:[#allocation7 + $0x664] ss:$16 sps:$4 sm:$0xff]  }
  0xfe   :  { %1588 = vmatprep.subr.bf16.mxu0 %v5355_v26  ;;  %1752 = vmatprep.subr.bf16.mxu1 %v5358_v27  ;;  %v5448_v26 = vld [vmem:[#allocation7 + $0x66c] ss:$16 sps:$4 sm:$0xff]   ;;  %v5443_v27 = vld [vmem:[#allocation7 + $0x660] ss:$16 sps:$4 sm:$0xff]  }
 0x101   :  { %1589 = vmatpush1.bf16.msra.mxu0 %v5353_v28  ;;  %1753 = vmatpush1.bf16.msra.mxu1 %v5356_v29  ;;  %v5446_v28 = vld [vmem:[#allocation7 + $0x668] ss:$16 sps:$4 sm:$0xff]   ;;  %v5451_v29 = vld [vmem:[#allocation7 + $0x684] ss:$16 sps:$4 sm:$0xff]  }
 0x102   :  { %1590 = vmatprep.subr.bf16.mxu0 %v5361_v30  ;;  %1754 = vmatprep.subr.bf16.mxu1 %v5364_v31  ;;  %v5454_v30 = vld [vmem:[#allocation7 + $0x68c] ss:$16 sps:$4 sm:$0xff]   ;;  %v5449_v31 = vld [vmem:[#allocation7 + $0x680] ss:$16 sps:$4 sm:$0xff]  }
 0x105   :  { %1591 = vmatpush1.bf16.msra.mxu0 %v5359_v32  ;;  %1755 = vmatpush1.bf16.msra.mxu1 %v5362_v33  ;;  %v5452_v32 = vld [vmem:[#allocation7 + $0x688] ss:$16 sps:$4 sm:$0xff]   ;;  %v5457_v33 = vld [vmem:[#allocation7 + $0x6a4] ss:$16 sps:$4 sm:$0xff]  }
 0x106   :  { %1592 = vmatprep.subr.bf16.mxu0 %v5367_v34  ;;  %1756 = vmatprep.subr.bf16.mxu1 %v5370_v35  ;;  %v5460_v34 = vld [vmem:[#allocation7 + $0x6ac] ss:$16 sps:$4 sm:$0xff]   ;;  %v5455_v35 = vld [vmem:[#allocation7 + $0x6a0] ss:$16 sps:$4 sm:$0xff]  }
 0x109   :  { %1593 = vmatpush1.bf16.msra.mxu0 %v5365_v36  ;;  %1757 = vmatpush1.bf16.msra.mxu1 %v5368_v37  ;;  %v5458_v36 = vld [vmem:[#allocation7 + $0x6a8] ss:$16 sps:$4 sm:$0xff]   ;;  %v5463_v37 = vld [vmem:[#allocation7 + $0x6c4] ss:$16 sps:$4 sm:$0xff]  }
 0x10a   :  { %1594 = vmatprep.subr.bf16.mxu0 %v5373_v38  ;;  %1758 = vmatprep.subr.bf16.mxu1 %v5376_v39  ;;  %v5466_v38 = vld [vmem:[#allocation7 + $0x6cc] ss:$16 sps:$4 sm:$0xff]   ;;  %v5461_v39 = vld [vmem:[#allocation7 + $0x6c0] ss:$16 sps:$4 sm:$0xff]  }
 0x10d   :  { %1595 = vmatpush1.bf16.msra.mxu0 %v5371_v40  ;;  %1759 = vmatpush1.bf16.msra.mxu1 %v5374_v41  ;;  %v5464_v40 = vld [vmem:[#allocation7 + $0x6c8] ss:$16 sps:$4 sm:$0xff]   ;;  %v5469_v41 = vld [vmem:[#allocation7 + $0x6e4] ss:$16 sps:$4 sm:$0xff]  }
 0x10e   :  { %1596 = vmatprep.subr.bf16.mxu0 %v5379_v42  ;;  %1760 = vmatprep.subr.bf16.mxu1 %v5382_v43  ;;  %v5472_v42 = vld [vmem:[#allocation7 + $0x6ec] ss:$16 sps:$4 sm:$0xff]   ;;  %v5467_v43 = vld [vmem:[#allocation7 + $0x6e0] ss:$16 sps:$4 sm:$0xff]  }
 0x111   :  { %1597 = vmatpush1.bf16.msra.mxu0 %v5377_v44  ;;  %1761 = vmatpush1.bf16.msra.mxu1 %v5380_v45  ;;  %v5470_v44 = vld [vmem:[#allocation7 + $0x6e8] ss:$16 sps:$4 sm:$0xff]   ;;  %v124_v45 = vld [vmem:[#allocation2 + $0x30] sm:$0xff] }
 0x112   :  { %1598 = vmatprep.subr.bf16.mxu0 %v5385_v46  ;;  %1762 = vmatprep.subr.bf16.mxu1 %v5388_v47  ;;  %v5475_v46 = vld [vmem:[#allocation8 + $0x4] ss:$8 sps:$4 sm:$0xff]   ;;  %v5473_v47 = vld [vmem:[#allocation8] ss:$8 sps:$4 sm:$0xff]  }
 0x115   :  { %1599 = vmatpush1.bf16.msra.mxu0 %v5383_v48  ;;  %1763 = vmatpush1.bf16.msra.mxu1 %v5386_v49  ;;  %v131_v48 = vpack.c.bf16 %v124_v45, %v124_v45  ;;  %v5478_v49 = vld [vmem:[#allocation8 + $0x14] ss:$8 sps:$4 sm:$0xff]  }
 0x116   :  { %1600 = vmatprep.subr.bf16.mxu0 %v5391_v50  ;;  %1764 = vmatprep.subr.bf16.mxu1 %v5394_v51  ;;  %v5476_v50 = vld [vmem:[#allocation8 + $0x10] ss:$8 sps:$4 sm:$0xff]   ;;  %v5481_v51 = vld [vmem:[#allocation8 + $0x24] ss:$8 sps:$4 sm:$0xff]  }
 0x119   :  { %1601 = vmatpush1.bf16.msra.mxu0 %v5389_v52  ;;  %1765 = vmatpush1.bf16.msra.mxu1 %v5392_v53  ;;  %v5479_v52 = vld [vmem:[#allocation8 + $0x20] ss:$8 sps:$4 sm:$0xff]   ;;  %v5484_v53 = vld [vmem:[#allocation8 + $0x34] ss:$8 sps:$4 sm:$0xff]  }
 0x11a   :  { %1602 = vmatprep.subr.bf16.mxu0 %v5397_v54  ;;  %1766 = vmatprep.subr.bf16.mxu1 %v5400_v55  ;;  %v5482_v54 = vld [vmem:[#allocation8 + $0x30] ss:$8 sps:$4 sm:$0xff]   ;;  %v5487_v55 = vld [vmem:[#allocation8 + $0x44] ss:$8 sps:$4 sm:$0xff]  }
 0x11d   :  { %1603 = vmatpush1.bf16.msra.mxu0 %v5395_v56  ;;  %1767 = vmatpush1.bf16.msra.mxu1 %v5398_v57  ;;  %v5485_v56 = vld [vmem:[#allocation8 + $0x40] ss:$8 sps:$4 sm:$0xff]   ;;  %v5490_v57 = vld [vmem:[#allocation8 + $0x54] ss:$8 sps:$4 sm:$0xff]  }
 0x11e   :  { %1604 = vmatprep.subr.bf16.mxu0 %v5403_v58  ;;  %1768 = vmatprep.subr.bf16.mxu1 %v5406_v59  ;;  %v5488_v58 = vld [vmem:[#allocation8 + $0x50] ss:$8 sps:$4 sm:$0xff]   ;;  %v5493_v59 = vld [vmem:[#allocation8 + $0x64] ss:$8 sps:$4 sm:$0xff]  }
 0x121   :  { %1605 = vmatpush1.bf16.msra.mxu0 %v5401_v60  ;;  %1769 = vmatpush1.bf16.msra.mxu1 %v5404_v61  ;;  %v5491_v60 = vld [vmem:[#allocation8 + $0x60] ss:$8 sps:$4 sm:$0xff]   ;;  %v5496_v61 = vld [vmem:[#allocation8 + $0x74] ss:$8 sps:$4 sm:$0xff]  }
 0x122   :  { %1606 = vmatprep.subr.bf16.mxu0 %v5409_v62  ;;  %1770 = vmatprep.subr.bf16.mxu1 %v5412_v63  ;;  %v5494_v62 = vld [vmem:[#allocation8 + $0x70] ss:$8 sps:$4 sm:$0xff]   ;;  %v5499_v63 = vld [vmem:[#allocation8 + $0x84] ss:$8 sps:$4 sm:$0xff]  }
 0x125   :  { %1607 = vmatpush1.bf16.msra.mxu0 %v5407_v0  ;;  %1771 = vmatpush1.bf16.msra.mxu1 %v5410_v1  ;;  %v5497_v0 = vld [vmem:[#allocation8 + $0x80] ss:$8 sps:$4 sm:$0xff]   ;;  %v5502_v1 = vld [vmem:[#allocation8 + $0x94] ss:$8 sps:$4 sm:$0xff]  }
 0x126   :  { %1608 = vmatprep.subr.bf16.mxu0 %v5415_v2  ;;  %1772 = vmatprep.subr.bf16.mxu1 %v5418_v3  ;;  %v5500_v2 = vld [vmem:[#allocation8 + $0x90] ss:$8 sps:$4 sm:$0xff]   ;;  %v5505_v3 = vld [vmem:[#allocation8 + $0xa4] ss:$8 sps:$4 sm:$0xff]  }
 0x129   :  { %1609 = vmatpush1.bf16.msra.mxu0 %v5413_v4  ;;  %1773 = vmatpush1.bf16.msra.mxu1 %v5416_v5  ;;  %v5503_v4 = vld [vmem:[#allocation8 + $0xa0] ss:$8 sps:$4 sm:$0xff]   ;;  %v5508_v5 = vld [vmem:[#allocation8 + $0xb4] ss:$8 sps:$4 sm:$0xff]  }
 0x12a   :  { %1610 = vmatprep.subr.bf16.mxu0 %v5421_v6  ;;  %1774 = vmatprep.subr.bf16.mxu1 %v5424_v7  ;;  %v5506_v6 = vld [vmem:[#allocation8 + $0xb0] ss:$8 sps:$4 sm:$0xff]   ;;  %v5511_v7 = vld [vmem:[#allocation8 + $0xc4] ss:$8 sps:$4 sm:$0xff]  }
 0x12d   :  { %1611 = vmatpush1.bf16.msra.mxu0 %v5419_v8  ;;  %1775 = vmatpush1.bf16.msra.mxu1 %v5422_v9  ;;  %v5509_v8 = vld [vmem:[#allocation8 + $0xc0] ss:$8 sps:$4 sm:$0xff]   ;;  %v5514_v9 = vld [vmem:[#allocation8 + $0xd4] ss:$8 sps:$4 sm:$0xff]  }
 0x12e   :  { %1621 = vmatprep.subr.bf16.mxu0 %v5427_v11  ;;  %1785 = vmatprep.subr.bf16.mxu1 %v5430_v12  ;;  %v5517_v11 = vld [vmem:[#allocation8 + $0xe4] ss:$8 sps:$4 sm:$0xff]   ;;  %v5515_v12 = vld [vmem:[#allocation8 + $0xe0] ss:$8 sps:$4 sm:$0xff]  }
 0x130   :  { %1613 = vmatmul.mubr.bf16.vlgmr.msra.gmra.mrb[0].mxu0 %v129_v15  ;;  %1777 = vmatmul.mubr.bf16.vlgmr.msra.gmra.mrb[0].mxu1 %v129_v15  ;;  %v5523_v15 = vld [vmem:[#allocation8 + $0x104] ss:$8 sps:$4 sm:$0xff]  }
 0x131   :  { %1622 = vmatpush1.bf16.msra.mxu0 %v5425_v13  ;;  %1786 = vmatpush1.bf16.msra.mxu1 %v5428_v14  ;;  %v5520_v13 = vld [vmem:[#allocation8 + $0xf4] ss:$8 sps:$4 sm:$0xff]   ;;  %v5518_v14 = vld [vmem:[#allocation8 + $0xf0] ss:$8 sps:$4 sm:$0xff]  }
 0x132   :  { %1623 = vmatprep.subr.bf16.mxu0 %v5433_v16  ;;  %1787 = vmatprep.subr.bf16.mxu1 %v5436_v17  ;;  %v5569_v16 = vld [vmem:[#allocation10] ss:$16 sps:$4 sm:$0xff]   ;;  %v5571_v17 = vld [vmem:[#allocation10 + $0x4] ss:$16 sps:$4 sm:$0xff]  }
 0x133   :  { %1653 = vmatprep.mubr.bf16.mxu0 %v6165_v24  ;;  %1817 = vmatprep.mubr.bf16.mxu1 %v6165_v24 }
 0x135   :  { %1624 = vmatpush1.bf16.msra.mxu0 %v5431_v18  ;;  %1788 = vmatpush1.bf16.msra.mxu1 %v5434_v19  ;;  %v5574_v18 = vld [vmem:[#allocation10 + $0x24] ss:$16 sps:$4 sm:$0xff]   ;;  %v5572_v19 = vld [vmem:[#allocation10 + $0x20] ss:$16 sps:$4 sm:$0xff]  }
 0x136   :  { %1625 = vmatprep.subr.bf16.mxu0 %v5439_v20  ;;  %1789 = vmatprep.subr.bf16.mxu1 %v5442_v21  ;;  %v5577_v20 = vld [vmem:[#allocation10 + $0x44] ss:$16 sps:$4 sm:$0xff]   ;;  %v5575_v21 = vld [vmem:[#allocation10 + $0x40] ss:$16 sps:$4 sm:$0xff]  }
 0x139   :  { %1626 = vmatpush1.bf16.msra.mxu0 %v5437_v22  ;;  %1790 = vmatpush1.bf16.msra.mxu1 %v5440_v23  ;;  %v5580_v22 = vld [vmem:[#allocation10 + $0x64] ss:$16 sps:$4 sm:$0xff]   ;;  %v5578_v23 = vld [vmem:[#allocation10 + $0x60] ss:$16 sps:$4 sm:$0xff]  }
 0x13a   :  { %1627 = vmatprep.subr.bf16.mxu0 %v5445_v25  ;;  %1791 = vmatprep.subr.bf16.mxu1 %v5448_v26  ;;  %v5583_v25 = vld [vmem:[#allocation10 + $0x84] ss:$16 sps:$4 sm:$0xff]   ;;  %v5581_v26 = vld [vmem:[#allocation10 + $0x80] ss:$16 sps:$4 sm:$0xff]  }
 0x13d   :  { %1628 = vmatpush1.bf16.msra.mxu0 %v5443_v27  ;;  %1792 = vmatpush1.bf16.msra.mxu1 %v5446_v28  ;;  %v5586_v27 = vld [vmem:[#allocation10 + $0xa4] ss:$16 sps:$4 sm:$0xff]   ;;  %v5584_v28 = vld [vmem:[#allocation10 + $0xa0] ss:$16 sps:$4 sm:$0xff]  }
 0x13e   :  { %1629 = vmatprep.subr.bf16.mxu0 %v5451_v29  ;;  %1793 = vmatprep.subr.bf16.mxu1 %v5454_v30  ;;  %v358_v29 = vlaneseq }
 0x140   :  { %v6324_v30 = vshrl.u32 %v358_v29, 7  ;;  %v5587_v29 = vld [vmem:[#allocation10 + $0xc0] ss:$16 sps:$4 sm:$0xff]  }
 0x141   :  { %1630 = vmatpush1.bf16.msra.mxu0 %v5449_v31  ;;  %1794 = vmatpush1.bf16.msra.mxu1 %v5452_v32  ;;  %v6332_v32 = vld [vmem:[%s6446_s3] sm:$0xf] }
 0x142   :  { %1631 = vmatprep.subr.bf16.mxu0 %v5457_v33  ;;  %1795 = vmatprep.subr.bf16.mxu1 %v5460_v34  ;;  %v6327_v31 = vsub.s32 0, %v6324_v30  ;;  %v6335_v33 = vsub.s32 1, %v6324_v30  ;;  %v6338_v34 = vsub.s32 3, %v6324_v30 }
 0x145   :  { %1632 = vmatpush1.bf16.msra.mxu0 %v5455_v35  ;;  %1796 = vmatpush1.bf16.msra.mxu1 %v5458_v36  ;;  %v361_v35 = vrot.slane %v6332_v32, %v6327_v31  ;;  %v365_v36 = vrot.slane %v6332_v32, %v6335_v33 }
 0x146   :  { %1633 = vmatprep.subr.bf16.mxu0 %v5463_v37  ;;  %1797 = vmatprep.subr.bf16.mxu1 %v5466_v38  ;;  %v373_v37 = vrot.slane %v6332_v32, %v6338_v34 }
 0x149   :  { %1634 = vmatpush1.bf16.msra.mxu0 %v5461_v39  ;;  %1798 = vmatpush1.bf16.msra.mxu1 %v5464_v40 }
 0x14a   :  { %1635 = vmatprep.subr.bf16.mxu0 %v5469_v41  ;;  %1799 = vmatprep.subr.bf16.mxu1 %v5472_v42 }
 0x14d   :  { %1636 = vmatpush1.bf16.msra.mxu0 %v5467_v43  ;;  %1800 = vmatpush1.bf16.msra.mxu1 %v5470_v44 }
 0x14e   :  { %2230 = vmatprep.subr.bf16.mxu0 %v5475_v46  ;;  %2533 = vmatprep.subr.bf16.mxu1 %v5571_v17  ;;  %v5562_v17 = vld [vmem:[#allocation8 + $0x1d4] ss:$8 sps:$4 sm:$0xff]  }
 0x150   :  { %1654 = vmatmul.mubr.bf16.vlgmr.msra.gmra.mrb[0].mxu0 %v131_v48  ;;  %1818 = vmatmul.mubr.bf16.vlgmr.msra.gmra.mrb[0].mxu1 %v131_v48 }
 0x151   :  { %2231 = vmatpush1.bf16.msra.mxu0 %v5473_v47  ;;  %2565 = vmatprep.mubr.bf16.mxu1 %v6165_v24 }
 0x152   :  { %2232 = vmatprep.subr.bf16.mxu0 %v5478_v49  ;;  %2534 = vmatpush1.bf16.msra.mxu1 %v5569_v16  ;;  %v6349_v16 = vsub.s32 2, %v6324_v30 }
 0x153   :  { %2535 = vmatprep.subr.bf16.mxu1 %v5574_v18  ;;  %v5560_v18 = vld [vmem:[#allocation8 + $0x1d0] ss:$8 sps:$4 sm:$0xff]  }
 0x155   :  { %2233 = vmatpush1.bf16.msra.mxu0 %v5476_v50 }
 0x156   :  { %2234 = vmatprep.subr.bf16.mxu0 %v5481_v51  ;;  %2536 = vmatpush1.bf16.msra.mxu1 %v5572_v19  ;;  %v369_v19 = vrot.slane %v6332_v32, %v6349_v16  ;;  %v5592_v32 = vld [vmem:[#allocation10 + $0xe4] ss:$16 sps:$4 sm:$0xff]  }
 0x157   :  { %2537 = vmatprep.subr.bf16.mxu1 %v5577_v20  ;;  %v5565_v20 = vld [vmem:[#allocation8 + $0x1e4] ss:$8 sps:$4 sm:$0xff]  }
 0x159   :  { %2235 = vmatpush1.bf16.msra.mxu0 %v5479_v52 }
 0x15a   :  { %2236 = vmatprep.subr.bf16.mxu0 %v5484_v53  ;;  %2538 = vmatpush1.bf16.msra.mxu1 %v5575_v21  ;;  %v5521_v53 = vld [vmem:[#allocation8 + $0x100] ss:$8 sps:$4 sm:$0xff]  }
 0x15b   :  { %2539 = vmatprep.subr.bf16.mxu1 %v5580_v22  ;;  %v5563_v21 = vld [vmem:[#allocation8 + $0x1e0] ss:$8 sps:$4 sm:$0xff]  }
 0x15d   :  { %2237 = vmatpush1.bf16.msra.mxu0 %v5482_v54 }
 0x15e   :  { %2238 = vmatprep.subr.bf16.mxu0 %v5487_v55  ;;  %2540 = vmatpush1.bf16.msra.mxu1 %v5578_v23  ;;  %v5526_v55 = vld [vmem:[#allocation8 + $0x114] ss:$8 sps:$4 sm:$0xff]  }
 0x15f   :  { %2541 = vmatprep.subr.bf16.mxu1 %v5583_v25  ;;  %v5568_v23 = vld [vmem:[#allocation8 + $0x1f4] ss:$8 sps:$4 sm:$0xff]   ;;  %v5566_v25 = vld [vmem:[#allocation8 + $0x1f0] ss:$8 sps:$4 sm:$0xff]  }
 0x161   :  { %2239 = vmatpush1.bf16.msra.mxu0 %v5485_v56 }
 0x162   :  { %2240 = vmatprep.subr.bf16.mxu0 %v5490_v57  ;;  %2542 = vmatpush1.bf16.msra.mxu1 %v5581_v26  ;;  %v5524_v57 = vld [vmem:[#allocation8 + $0x110] ss:$8 sps:$4 sm:$0xff]  }
 0x163   :  { %2543 = vmatprep.subr.bf16.mxu1 %v5586_v27 }
 0x165   :  { %2241 = vmatpush1.bf16.msra.mxu0 %v5488_v58  ;;  %v5529_v58 = vld [vmem:[#allocation8 + $0x124] ss:$8 sps:$4 sm:$0xff]  }
 0x166   :  { %2242 = vmatprep.subr.bf16.mxu0 %v5493_v59  ;;  %2544 = vmatpush1.bf16.msra.mxu1 %v5584_v28  ;;  %v5527_v59 = vld [vmem:[#allocation8 + $0x120] ss:$8 sps:$4 sm:$0xff]   ;;  %v5589_v28 = vld [vmem:[#allocation10 + $0xc4] ss:$16 sps:$4 sm:$0xff]  }
 0x167   :  { %2545 = vmatprep.subr.bf16.mxu1 %v5589_v28  ;;  %v5613_v28 = vld [vmem:[#allocation10 + $0xcc] ss:$16 sps:$4 sm:$0xff]  }
 0x169   :  { %2243 = vmatpush1.bf16.msra.mxu0 %v5491_v60  ;;  %v5532_v60 = vld [vmem:[#allocation8 + $0x134] ss:$8 sps:$4 sm:$0xff]  }
 0x16a   :  { %2244 = vmatprep.subr.bf16.mxu0 %v5496_v61  ;;  %v5530_v61 = vld [vmem:[#allocation8 + $0x130] ss:$8 sps:$4 sm:$0xff]   ;;  %2546 = vmatpush1.bf16.msra.mxu1 %v5587_v29  ;;  %v5616_v29 = vld [vmem:[#allocation10 + $0xec] ss:$16 sps:$4 sm:$0xff]  }
 0x16b   :  { %2547 = vmatprep.subr.bf16.mxu1 %v5592_v32  ;;  %v5614_v32 = vld [vmem:[#allocation10 + $0xe8] ss:$16 sps:$4 sm:$0xff]  }
 0x16d   :  { %2245 = vmatpush1.bf16.msra.mxu0 %v5494_v62  ;;  %v5535_v62 = vld [vmem:[#allocation8 + $0x144] ss:$8 sps:$4 sm:$0xff]  }
 0x16e   :  { %2246 = vmatprep.subr.bf16.mxu0 %v5499_v63  ;;  %v5533_v63 = vld [vmem:[#allocation8 + $0x140] ss:$8 sps:$4 sm:$0xff]  }
 0x171   :  { %2247 = vmatpush1.bf16.msra.mxu0 %v5497_v0  ;;  %v5538_v0 = vld [vmem:[#allocation8 + $0x154] ss:$8 sps:$4 sm:$0xff]  }
 0x172   :  { %2248 = vmatprep.subr.bf16.mxu0 %v5502_v1  ;;  %v5536_v1 = vld [vmem:[#allocation8 + $0x150] ss:$8 sps:$4 sm:$0xff]  }
 0x175   :  { %2249 = vmatpush1.bf16.msra.mxu0 %v5500_v2  ;;  %v5541_v2 = vld [vmem:[#allocation8 + $0x164] ss:$8 sps:$4 sm:$0xff]  }
 0x176   :  { %2250 = vmatprep.subr.bf16.mxu0 %v5505_v3  ;;  %v5539_v3 = vld [vmem:[#allocation8 + $0x160] ss:$8 sps:$4 sm:$0xff]  }
 0x179   :  { %2251 = vmatpush1.bf16.msra.mxu0 %v5503_v4  ;;  %v5544_v4 = vld [vmem:[#allocation8 + $0x174] ss:$8 sps:$4 sm:$0xff]  }
 0x17a   :  { %2252 = vmatprep.subr.bf16.mxu0 %v5508_v5  ;;  %v5542_v5 = vld [vmem:[#allocation8 + $0x170] ss:$8 sps:$4 sm:$0xff]  }
 0x17d   :  { %2253 = vmatpush1.bf16.msra.mxu0 %v5506_v6  ;;  %v5547_v6 = vld [vmem:[#allocation8 + $0x184] ss:$8 sps:$4 sm:$0xff]  }
 0x17e   :  { %2254 = vmatprep.subr.bf16.mxu0 %v5511_v7  ;;  %v5545_v7 = vld [vmem:[#allocation8 + $0x180] ss:$8 sps:$4 sm:$0xff]  }
 0x181   :  { %2255 = vmatpush1.bf16.msra.mxu0 %v5509_v8  ;;  %v5550_v8 = vld [vmem:[#allocation8 + $0x194] ss:$8 sps:$4 sm:$0xff]  }
 0x182   :  { %2256 = vmatprep.subr.bf16.mxu0 %v5514_v9  ;;  %v5548_v9 = vld [vmem:[#allocation8 + $0x190] ss:$8 sps:$4 sm:$0xff]  }
 0x185   :  { %2257 = vmatpush1.bf16.msra.mxu0 %v5512_v10  ;;  %v5553_v10 = vld [vmem:[#allocation8 + $0x1a4] ss:$8 sps:$4 sm:$0xff]  }
 0x186   :  { %2258 = vmatprep.subr.bf16.mxu0 %v5517_v11  ;;  %v5551_v11 = vld [vmem:[#allocation8 + $0x1a0] ss:$8 sps:$4 sm:$0xff]  }
 0x189   :  { %2259 = vmatpush1.bf16.msra.mxu0 %v5515_v12  ;;  %v5556_v12 = vld [vmem:[#allocation8 + $0x1b4] ss:$8 sps:$4 sm:$0xff]  }
 0x18a   :  { %2260 = vmatprep.subr.bf16.mxu0 %v5520_v13  ;;  %v5554_v13 = vld [vmem:[#allocation8 + $0x1b0] ss:$8 sps:$4 sm:$0xff]  }
 0x18d   :  { %2261 = vmatpush1.bf16.msra.mxu0 %v5518_v14  ;;  %v5559_v14 = vld [vmem:[#allocation8 + $0x1c4] ss:$8 sps:$4 sm:$0xff]  }
 0x18e   :  { %2271 = vmatprep.subr.bf16.mxu0 %v5523_v15  ;;  %v5557_v15 = vld [vmem:[#allocation8 + $0x1c0] ss:$8 sps:$4 sm:$0xff]  }
 0x223   :  { %v1655_v38 = vpop.f32.mrb[0].mxu0  ;;  %v6346_v39 = vpop.f32.mrb[0].mxu1 }
 0x224   :  { %v5070_v40 = vadd.f32 %v1655_v38, %v361_v35  ;;  %v1657_v41 = vpop.f32.mrb[1].mxu0  ;;  %v1821_v42 = vpop.f32.mrb[1].mxu1  ;;  %v5072_v22 = vadd.f32 %v6346_v39, %v369_v19  ;;  %v5590_v35 = vld [vmem:[#allocation10 + $0xe0] ss:$16 sps:$4 sm:$0xff]   ;;  %v5622_v38 = vld [vmem:[#allocation11 + $0xc] ss:$28 sps:$4 sm:$0xff]  }
 0x225   :  { %v5071_v43 = vadd.f32 %v1657_v41, %v365_v36  ;;  %v5073_v44 = vadd.f32 %v1821_v42, %v373_v37  ;;  %v1659_v45 = vpop.f32.mrb[2].mxu0  ;;  %v1823_v46 = vpop.f32.mrb[2].mxu1  ;;  %2548 = vmatpush1.bf16.msra.mxu1 %v5590_v35  ;;  %v5595_v36 = vld [vmem:[#allocation10 + $0xc] ss:$16 sps:$4 sm:$0xff]   ;;  %v5620_v37 = vld [vmem:[#allocation11 + $0x8] ss:$28 sps:$4 sm:$0xff]  }
 0x226   :  { %v1826_v47 = vmax.f32 %v5070_v40, 0.0  ;;  %v1660_v48 = vpop.f32.mrb[3].mxu0  ;;  %v1824_v49 = vpop.f32.mrb[3].mxu1  ;;  %v1828_v26 = vmax.f32 %v5072_v22, 0.0  ;;  %2574 = vmatprep.subr.bf16.mxu1 %v5595_v36  ;;  %v5628_v39 = vld [vmem:[#allocation11 + $0x44] ss:$28 sps:$4 sm:$0xff]  }
 0x227   :  { %v1827_v50 = vmax.f32 %v5071_v43, 0.0  ;;  %v1829_v51 = vmax.f32 %v5073_v44, 0.0  ;;  %v5626_v40 = vld [vmem:[#allocation11 + $0x40] ss:$28 sps:$4 sm:$0xff]   ;;  %v5632_v42 = vld [vmem:[#allocation11 + $0x78] ss:$28 sps:$4 sm:$0xff]  }
 0x228   :  { %v1830_v54 = vpack.c.bf16 %v1826_v47, %v1826_v47  ;;  %v1832_v27 = vpack.c.bf16 %v1828_v26, %v1828_v26  ;;  %v5634_v41 = vld [vmem:[#allocation11 + $0x7c] ss:$28 sps:$4 sm:$0xff]   ;;  %v5640_v43 = vld [vmem:[#allocation11 + $0xb4] ss:$28 sps:$4 sm:$0xff]   ;;  %v5646_v45 = vld [vmem:[#allocation11 + $0xec] ss:$28 sps:$4 sm:$0xff]  }
 0x229   :  { %v1831_v52 = vpack.c.bf16 %v1827_v50, %v1827_v50  ;;  %v1833_v56 = vpack.c.bf16 %v1829_v51, %v1829_v51  ;;  %v5638_v44 = vld [vmem:[#allocation11 + $0xb0] ss:$28 sps:$4 sm:$0xff]   ;;  %v5644_v46 = vld [vmem:[#allocation11 + $0xe8] ss:$28 sps:$4 sm:$0xff]   ;;  %v5650_v48 = vld [vmem:[#allocation11 + $0x120] ss:$28 sps:$4 sm:$0xff]  }
 0x22a   :  { %v5652_v47 = vld [vmem:[#allocation11 + $0x124] ss:$28 sps:$4 sm:$0xff]   ;;  %v5658_v49 = vld [vmem:[#allocation11 + $0x15c] ss:$28 sps:$4 sm:$0xff]   ;;  %v5664_v51 = vld [vmem:[#allocation11 + $0x194] ss:$28 sps:$4 sm:$0xff]  }
 0x22b   :  { %2262 = vmatprep.mubr.bf16.mxu0 %v1831_v52  ;;  %v5656_v50 = vld [vmem:[#allocation11 + $0x158] ss:$28 sps:$4 sm:$0xff]   ;;  %v5662_v52 = vld [vmem:[#allocation11 + $0x190] ss:$28 sps:$4 sm:$0xff]   ;;  %v5619_v35 = vld [vmem:[#allocation11 + $0x4] ss:$28 sps:$4 sm:$0xff]  }
 0x22c   :  { %2263 = vmatmul.mubr.bf16.vlgmr.msra.gmra.mrb[4].mxu0 %v1830_v54  ;;  %v5668_v54 = vld [vmem:[#allocation11 + $0x1c8] ss:$28 sps:$4 sm:$0xff]   ;;  %v5601_v19 = vld [vmem:[#allocation10 + $0x4c] ss:$16 sps:$4 sm:$0xff]  }
 0x22d   :  { %2272 = vmatpush1.bf16.msra.mxu0 %v5521_v53  ;;  %2303 = vmatprep.mubr.bf16.mxu0 %v1833_v56  ;;  %v5670_v53 = vld [vmem:[#allocation11 + $0x1cc] ss:$28 sps:$4 sm:$0xff]   ;;  %v5674_v56 = vld [vmem:[#allocation11 + $0x200] ss:$28 sps:$4 sm:$0xff]  }
 0x22e   :  { %2273 = vmatprep.subr.bf16.mxu0 %v5526_v55  ;;  %v5676_v55 = vld [vmem:[#allocation11 + $0x204] ss:$28 sps:$4 sm:$0xff]   ;;  %v5602_v22 = vld [vmem:[#allocation10 + $0x68] ss:$16 sps:$4 sm:$0xff]   ;;  %v5610_v26 = vld [vmem:[#allocation10 + $0xac] ss:$16 sps:$4 sm:$0xff]  }
 0x22f   :  { %v5617_v36 = vld [vmem:[#allocation11] ss:$28 sps:$4 sm:$0xff]  }
 0x231   :  { %2274 = vmatpush1.bf16.msra.mxu0 %v5524_v57  ;;  %v5682_v57 = vld [vmem:[#allocation11 + $0x23c] ss:$28 sps:$4 sm:$0xff]  }
 0x232   :  { %2275 = vmatprep.subr.bf16.mxu0 %v5529_v58  ;;  %v5680_v58 = vld [vmem:[#allocation11 + $0x238] ss:$28 sps:$4 sm:$0xff]  }
 0x235   :  { %2276 = vmatpush1.bf16.msra.mxu0 %v5527_v59  ;;  %v5688_v59 = vld [vmem:[#allocation11 + $0x274] ss:$28 sps:$4 sm:$0xff]  }
 0x236   :  { %2277 = vmatprep.subr.bf16.mxu0 %v5532_v60  ;;  %v5686_v60 = vld [vmem:[#allocation11 + $0x270] ss:$28 sps:$4 sm:$0xff]  }
 0x239   :  { %2278 = vmatpush1.bf16.msra.mxu0 %v5530_v61  ;;  %v5694_v61 = vld [vmem:[#allocation11 + $0x2ac] ss:$28 sps:$4 sm:$0xff]  }
 0x23a   :  { %2279 = vmatprep.subr.bf16.mxu0 %v5535_v62  ;;  %v5692_v62 = vld [vmem:[#allocation11 + $0x2a8] ss:$28 sps:$4 sm:$0xff]  }
 0x23d   :  { %2280 = vmatpush1.bf16.msra.mxu0 %v5533_v63  ;;  %v5700_v63 = vld [vmem:[#allocation11 + $0x2e4] ss:$28 sps:$4 sm:$0xff]  }
 0x23e   :  { %2281 = vmatprep.subr.bf16.mxu0 %v5538_v0  ;;  %v5698_v0 = vld [vmem:[#allocation11 + $0x2e0] ss:$28 sps:$4 sm:$0xff]  }
 0x241   :  { %2282 = vmatpush1.bf16.msra.mxu0 %v5536_v1  ;;  %v1898_v1 = vld [vmem:[%s6448_s5] sm:$0x3] }
 0x242   :  { %2283 = vmatprep.subr.bf16.mxu0 %v5541_v2  ;;  %v1903_v2 = vrot.slane %v1898_v1, %v6327_v31 }
 0x245   :  { %2284 = vmatpush1.bf16.msra.mxu0 %v5539_v3  ;;  %v1907_v3 = vrot.slane %v1898_v1, %v6335_v33  ;;  %v5704_v1 = vld [vmem:[#allocation11 + $0x318] ss:$28 sps:$4 sm:$0xff]  }
 0x246   :  { %2285 = vmatprep.subr.bf16.mxu0 %v5544_v4 }
 0x249   :  { %2286 = vmatpush1.bf16.msra.mxu0 %v5542_v5 }
 0x24a   :  { %2287 = vmatprep.subr.bf16.mxu0 %v5547_v6 }
 0x24d   :  { %2288 = vmatpush1.bf16.msra.mxu0 %v5545_v7 }
 0x24e   :  { %2289 = vmatprep.subr.bf16.mxu0 %v5550_v8 }
 0x251   :  { %2290 = vmatpush1.bf16.msra.mxu0 %v5548_v9  ;;  %v2315_v9 = vld [vmem:[#allocation5] sm:$0xff] }
 0x252   :  { %2291 = vmatprep.subr.bf16.mxu0 %v5553_v10 }
 0x255   :  { %2292 = vmatpush1.bf16.msra.mxu0 %v5551_v11 }
 0x256   :  { %2293 = vmatprep.subr.bf16.mxu0 %v5556_v12 }
 0x259   :  { %2294 = vmatpush1.bf16.msra.mxu0 %v5554_v13 }
 0x25a   :  { %2295 = vmatprep.subr.bf16.mxu0 %v5559_v14  ;;  %v5593_v14 = vld [vmem:[#allocation10 + $0x8] ss:$16 sps:$4 sm:$0xff]  }
 0x25d   :  { %2296 = vmatpush1.bf16.msra.mxu0 %v5557_v15 }
 0x25e   :  { %2297 = vmatprep.subr.bf16.mxu0 %v5562_v17  ;;  %v5598_v17 = vld [vmem:[#allocation10 + $0x2c] ss:$16 sps:$4 sm:$0xff]  }
 0x261   :  { %2298 = vmatpush1.bf16.msra.mxu0 %v5560_v18  ;;  %v5596_v18 = vld [vmem:[#allocation10 + $0x28] ss:$16 sps:$4 sm:$0xff]  }
 0x262   :  { %2299 = vmatprep.subr.bf16.mxu0 %v5565_v20  ;;  %v5599_v20 = vld [vmem:[#allocation10 + $0x48] ss:$16 sps:$4 sm:$0xff]  }
 0x265   :  { %2300 = vmatpush1.bf16.msra.mxu0 %v5563_v21  ;;  %v5604_v21 = vld [vmem:[#allocation10 + $0x6c] ss:$16 sps:$4 sm:$0xff]  }
 0x266   :  { %2301 = vmatprep.subr.bf16.mxu0 %v5568_v23  ;;  %v5607_v23 = vld [vmem:[#allocation10 + $0x8c] ss:$16 sps:$4 sm:$0xff]  }
 0x269   :  { %2302 = vmatpush1.bf16.msra.mxu0 %v5566_v25  ;;  %v5605_v25 = vld [vmem:[#allocation10 + $0x88] ss:$16 sps:$4 sm:$0xff]  }
 0x26a   :  { %4150 = vmatprep.subr.bf16.mxu0 %v5622_v38  ;;  %v5623_v38 = vld [vmem:[#allocation11 + $0x38] ss:$28 sps:$4 sm:$0xff]  }
 0x26c   :  { %2304 = vmatmul.mubr.bf16.vlgmr.msra.gmra.mrb[4].mxu0 %v1832_v27  ;;  %v5608_v27 = vld [vmem:[#allocation10 + $0xa8] ss:$16 sps:$4 sm:$0xff]  }
 0x26d   :  { %4151 = vmatpush1.bf16.msra.mxu0 %v5620_v37  ;;  %v5625_v37 = vld [vmem:[#allocation11 + $0x3c] ss:$28 sps:$4 sm:$0xff]  }
 0x26e   :  { %4152 = vmatprep.subr.bf16.mxu0 %v5628_v39  ;;  %v5631_v39 = vld [vmem:[#allocation11 + $0x74] ss:$28 sps:$4 sm:$0xff]  }
 0x271   :  { %4153 = vmatpush1.bf16.msra.mxu0 %v5626_v40  ;;  %v5629_v40 = vld [vmem:[#allocation11 + $0x70] ss:$28 sps:$4 sm:$0xff]  }
 0x272   :  { %4154 = vmatprep.subr.bf16.mxu0 %v5634_v41  ;;  %v5637_v41 = vld [vmem:[#allocation11 + $0xac] ss:$28 sps:$4 sm:$0xff]  }
 0x275   :  { %4155 = vmatpush1.bf16.msra.mxu0 %v5632_v42  ;;  %v5635_v42 = vld [vmem:[#allocation11 + $0xa8] ss:$28 sps:$4 sm:$0xff]  }
 0x276   :  { %4156 = vmatprep.subr.bf16.mxu0 %v5640_v43  ;;  %v5643_v43 = vld [vmem:[#allocation11 + $0xe4] ss:$28 sps:$4 sm:$0xff]  }
 0x279   :  { %4157 = vmatpush1.bf16.msra.mxu0 %v5638_v44  ;;  %v5641_v44 = vld [vmem:[#allocation11 + $0xe0] ss:$28 sps:$4 sm:$0xff]  }
 0x27a   :  { %4158 = vmatprep.subr.bf16.mxu0 %v5646_v45  ;;  %v5649_v45 = vld [vmem:[#allocation11 + $0x11c] ss:$28 sps:$4 sm:$0xff]  }
 0x27d   :  { %4159 = vmatpush1.bf16.msra.mxu0 %v5644_v46  ;;  %v5647_v46 = vld [vmem:[#allocation11 + $0x118] ss:$28 sps:$4 sm:$0xff]  }
 0x27e   :  { %4160 = vmatprep.subr.bf16.mxu0 %v5652_v47  ;;  %v5655_v47 = vld [vmem:[#allocation11 + $0x154] ss:$28 sps:$4 sm:$0xff]  }
 0x281   :  { %4161 = vmatpush1.bf16.msra.mxu0 %v5650_v48  ;;  %v5653_v48 = vld [vmem:[#allocation11 + $0x150] ss:$28 sps:$4 sm:$0xff]  }
 0x282   :  { %4162 = vmatprep.subr.bf16.mxu0 %v5658_v49  ;;  %v5661_v49 = vld [vmem:[#allocation11 + $0x18c] ss:$28 sps:$4 sm:$0xff]  }
 0x285   :  { %4163 = vmatpush1.bf16.msra.mxu0 %v5656_v50  ;;  %v5659_v50 = vld [vmem:[#allocation11 + $0x188] ss:$28 sps:$4 sm:$0xff]  }
 0x286   :  { %4164 = vmatprep.subr.bf16.mxu0 %v5664_v51  ;;  %v5667_v51 = vld [vmem:[#allocation11 + $0x1c4] ss:$28 sps:$4 sm:$0xff]  }
 0x289   :  { %4165 = vmatpush1.bf16.msra.mxu0 %v5662_v52  ;;  %v5665_v52 = vld [vmem:[#allocation11 + $0x1c0] ss:$28 sps:$4 sm:$0xff]  }
 0x28a   :  { %4166 = vmatprep.subr.bf16.mxu0 %v5670_v53  ;;  %v5673_v53 = vld [vmem:[#allocation11 + $0x1fc] ss:$28 sps:$4 sm:$0xff]  }
 0x28d   :  { %4167 = vmatpush1.bf16.msra.mxu0 %v5668_v54  ;;  %v5671_v54 = vld [vmem:[#allocation11 + $0x1f8] ss:$28 sps:$4 sm:$0xff]  }
 0x28e   :  { %4168 = vmatprep.subr.bf16.mxu0 %v5676_v55  ;;  %v5679_v55 = vld [vmem:[#allocation11 + $0x234] ss:$28 sps:$4 sm:$0xff]  }
 0x291   :  { %4169 = vmatpush1.bf16.msra.mxu0 %v5674_v56  ;;  %v5677_v56 = vld [vmem:[#allocation11 + $0x230] ss:$28 sps:$4 sm:$0xff]  }
 0x292   :  { %4170 = vmatprep.subr.bf16.mxu0 %v5682_v57  ;;  %v5685_v57 = vld [vmem:[#allocation11 + $0x26c] ss:$28 sps:$4 sm:$0xff]  }
 0x295   :  { %4171 = vmatpush1.bf16.msra.mxu0 %v5680_v58  ;;  %v5683_v58 = vld [vmem:[#allocation11 + $0x268] ss:$28 sps:$4 sm:$0xff]  }
 0x296   :  { %4172 = vmatprep.subr.bf16.mxu0 %v5688_v59  ;;  %v5691_v59 = vld [vmem:[#allocation11 + $0x2a4] ss:$28 sps:$4 sm:$0xff]  }
 0x299   :  { %4173 = vmatpush1.bf16.msra.mxu0 %v5686_v60  ;;  %v5689_v60 = vld [vmem:[#allocation11 + $0x2a0] ss:$28 sps:$4 sm:$0xff]  }
 0x29a   :  { %4174 = vmatprep.subr.bf16.mxu0 %v5694_v61  ;;  %v5697_v61 = vld [vmem:[#allocation11 + $0x2dc] ss:$28 sps:$4 sm:$0xff]  }
 0x29d   :  { %4175 = vmatpush1.bf16.msra.mxu0 %v5692_v62  ;;  %v5695_v62 = vld [vmem:[#allocation11 + $0x2d8] ss:$28 sps:$4 sm:$0xff]  }
 0x29e   :  { %4176 = vmatprep.subr.bf16.mxu0 %v5700_v63  ;;  %v5703_v63 = vld [vmem:[#allocation11 + $0x314] ss:$28 sps:$4 sm:$0xff]  }
 0x2a1   :  { %4177 = vmatpush1.bf16.msra.mxu0 %v5698_v0  ;;  %v5706_v0 = vld [vmem:[#allocation11 + $0x31c] ss:$28 sps:$4 sm:$0xff]  }
 0x2a2   :  { %4178 = vmatprep.subr.bf16.mxu0 %v5706_v0  ;;  %v5766_v0 = vld [vmem:[#allocation11 + $0x54c] ss:$28 sps:$4 sm:$0xff]  }
 0x2a5   :  { %4179 = vmatpush1.bf16.msra.mxu0 %v5704_v1 }
 0x33f   :  { %v2305_v4 = vpop.f32.mrb[4].mxu0 }
 0x340   :  { %v5074_v5 = vadd.f32 %v2305_v4, %v1903_v2  ;;  %v2307_v6 = vpop.f32.mrb[5].mxu0  ;;  %v5701_v2 = vld [vmem:[#allocation11 + $0x310] ss:$28 sps:$4 sm:$0xff]  }
 0x341   :  { %v5075_v7 = vadd.f32 %v2307_v6, %v1907_v3  ;;  %v2309_v8 = vpop.f32.mrb[6].mxu0  ;;  %v5709_v3 = vld [vmem:[#allocation11 + $0x34c] ss:$28 sps:$4 sm:$0xff]   ;;  %v5712_v4 = vld [vmem:[#allocation11 + $0x354] ss:$28 sps:$4 sm:$0xff]  }
 0x342   :  { %2313 = vst [vmem:[#allocation13] sm:$0xff] %v5074_v5  ;;  %v2310_v10 = vpop.f32.mrb[7].mxu0  ;;  %4180 = vmatprep.subr.bf16.mxu0 %v5712_v4  ;;  %v5707_v6 = vld [vmem:[#allocation11 + $0x348] ss:$28 sps:$4 sm:$0xff]  }
 0x343   :  { %v2312_v11 = vmax.f32 %v5075_v7, 0.0  ;;  %v5715_v7 = vld [vmem:[#allocation11 + $0x384] ss:$28 sps:$4 sm:$0xff]   ;;  %v5718_v8 = vld [vmem:[#allocation11 + $0x38c] ss:$28 sps:$4 sm:$0xff]  }
 0x344   :  { %v5764_v4 = vld [vmem:[#allocation11 + $0x548] ss:$28 sps:$4 sm:$0xff]  }
 0x345   :  { %2314 = vst [vmem:[#allocation13 + $0x8] sm:$0xff] %v2312_v11  ;;  %v2316_v12 = vmul.f32 %v2315_v9, %v2312_v11  ;;  %v6363_v9 = vld [vmem:[%s6450_s7] sm:$0xf] }
 0x346   :  { %v2356_v10 = vrot.slane %v6363_v9, %v6327_v31  ;;  %v2360_v11 = vrot.slane %v6363_v9, %v6335_v33 }
 0x347   :  { %v2317_v13 = vadd.f32 %v5074_v5, %v2316_v12  ;;  %v5710_v5 = vld [vmem:[#allocation11 + $0x350] ss:$28 sps:$4 sm:$0xff]  }
 0x348   :  { %4181 = vmatpush1.bf16.msra.mxu0 %v5710_v5  ;;  %v5769_v5 = vld [vmem:[#allocation11 + $0x57c] ss:$28 sps:$4 sm:$0xff]  }
 0x349   :  { %v2318_v15 = vpack.c.bf16 %v2317_v13, %v2317_v13  ;;  %4191 = vmatprep.subr.bf16.mxu0 %v5718_v8  ;;  %v5770_v8 = vld [vmem:[#allocation11 + $0x580] ss:$28 sps:$4 sm:$0xff]  }
 0x34b   :  { %2566 = vmatmul.mubr.bf16.vlgmr.msra.gmra.mrb[4].mxu1 %v2318_v15 }
 0x34c   :  { %2575 = vmatpush1.bf16.msra.mxu1 %v5593_v14  ;;  %2606 = vmatprep.mubr.bf16.mxu1 %v6165_v24  ;;  %v5611_v24 = vld [vmem:[#allocation10 + $0xc8] ss:$16 sps:$4 sm:$0xff]  }
 0x34d   :  { %2576 = vmatprep.subr.bf16.mxu1 %v5598_v17 }
 0x350   :  { %2577 = vmatpush1.bf16.msra.mxu1 %v5596_v18 }
 0x351   :  { %2578 = vmatprep.subr.bf16.mxu1 %v5601_v19 }
 0x354   :  { %2579 = vmatpush1.bf16.msra.mxu1 %v5599_v20 }
 0x355   :  { %2580 = vmatprep.subr.bf16.mxu1 %v5604_v21 }
 0x358   :  { %2581 = vmatpush1.bf16.msra.mxu1 %v5602_v22  ;;  %v5713_v22 = vld [vmem:[#allocation11 + $0x380] ss:$28 sps:$4 sm:$0xff]  }
 0x359   :  { %2582 = vmatprep.subr.bf16.mxu1 %v5607_v23  ;;  %v5716_v23 = vld [vmem:[#allocation11 + $0x388] ss:$28 sps:$4 sm:$0xff]  }
 0x35c   :  { %2583 = vmatpush1.bf16.msra.mxu1 %v5605_v25 }
 0x35d   :  { %2584 = vmatprep.subr.bf16.mxu1 %v5610_v26  ;;  %v5721_v26 = vld [vmem:[#allocation11 + $0x3bc] ss:$28 sps:$4 sm:$0xff]  }
 0x360   :  { %2585 = vmatpush1.bf16.msra.mxu1 %v5608_v27  ;;  %v5724_v27 = vld [vmem:[#allocation11 + $0x3c4] ss:$28 sps:$4 sm:$0xff]  }
 0x361   :  { %2586 = vmatprep.subr.bf16.mxu1 %v5613_v28  ;;  %v5719_v28 = vld [vmem:[#allocation11 + $0x3b8] ss:$28 sps:$4 sm:$0xff]  }
 0x364   :  { %2587 = vmatpush1.bf16.msra.mxu1 %v5611_v24  ;;  %v5722_v24 = vld [vmem:[#allocation11 + $0x3c0] ss:$28 sps:$4 sm:$0xff]  }
 0x365   :  { %2588 = vmatprep.subr.bf16.mxu1 %v5616_v29  ;;  %v5727_v29 = vld [vmem:[#allocation11 + $0x3f4] ss:$28 sps:$4 sm:$0xff]  }
 0x368   :  { %2589 = vmatpush1.bf16.msra.mxu1 %v5614_v32  ;;  %v5730_v32 = vld [vmem:[#allocation11 + $0x3fc] ss:$28 sps:$4 sm:$0xff]  }
 0x369   :  { %4068 = vmatprep.subr.bf16.mxu1 %v5619_v35  ;;  %v5725_v35 = vld [vmem:[#allocation11 + $0x3f0] ss:$28 sps:$4 sm:$0xff]  }
 0x36b   :  { %2607 = vmatmul.mubr.bf16.vlgmr.msra.gmra.mrb[8].mxu1 %v2318_v15 }
 0x36c   :  { %4069 = vmatpush1.bf16.msra.mxu1 %v5617_v36  ;;  %v5728_v36 = vld [vmem:[#allocation11 + $0x3f8] ss:$28 sps:$4 sm:$0xff]  }
 0x36d   :  { %4070 = vmatprep.subr.bf16.mxu1 %v5625_v37  ;;  %v5733_v37 = vld [vmem:[#allocation11 + $0x42c] ss:$28 sps:$4 sm:$0xff]  }
 0x370   :  { %4071 = vmatpush1.bf16.msra.mxu1 %v5623_v38  ;;  %v5736_v38 = vld [vmem:[#allocation11 + $0x434] ss:$28 sps:$4 sm:$0xff]  }
 0x371   :  { %4072 = vmatprep.subr.bf16.mxu1 %v5631_v39  ;;  %v5731_v39 = vld [vmem:[#allocation11 + $0x428] ss:$28 sps:$4 sm:$0xff]  }
 0x374   :  { %4073 = vmatpush1.bf16.msra.mxu1 %v5629_v40  ;;  %v5734_v40 = vld [vmem:[#allocation11 + $0x430] ss:$28 sps:$4 sm:$0xff]  }
 0x375   :  { %4074 = vmatprep.subr.bf16.mxu1 %v5637_v41  ;;  %v5739_v41 = vld [vmem:[#allocation11 + $0x464] ss:$28 sps:$4 sm:$0xff]  }
 0x378   :  { %4075 = vmatpush1.bf16.msra.mxu1 %v5635_v42  ;;  %v5742_v42 = vld [vmem:[#allocation11 + $0x46c] ss:$28 sps:$4 sm:$0xff]  }
 0x379   :  { %4076 = vmatprep.subr.bf16.mxu1 %v5643_v43  ;;  %v5737_v43 = vld [vmem:[#allocation11 + $0x460] ss:$28 sps:$4 sm:$0xff]  }
 0x37c   :  { %4077 = vmatpush1.bf16.msra.mxu1 %v5641_v44  ;;  %v5740_v44 = vld [vmem:[#allocation11 + $0x468] ss:$28 sps:$4 sm:$0xff]  }
 0x37d   :  { %4078 = vmatprep.subr.bf16.mxu1 %v5649_v45  ;;  %v5745_v45 = vld [vmem:[#allocation11 + $0x49c] ss:$28 sps:$4 sm:$0xff]  }
 0x380   :  { %4079 = vmatpush1.bf16.msra.mxu1 %v5647_v46  ;;  %v5748_v46 = vld [vmem:[#allocation11 + $0x4a4] ss:$28 sps:$4 sm:$0xff]  }
 0x381   :  { %4080 = vmatprep.subr.bf16.mxu1 %v5655_v47  ;;  %v5743_v47 = vld [vmem:[#allocation11 + $0x498] ss:$28 sps:$4 sm:$0xff]  }
 0x384   :  { %4081 = vmatpush1.bf16.msra.mxu1 %v5653_v48  ;;  %v5746_v48 = vld [vmem:[#allocation11 + $0x4a0] ss:$28 sps:$4 sm:$0xff]  }
 0x385   :  { %4082 = vmatprep.subr.bf16.mxu1 %v5661_v49  ;;  %v5751_v49 = vld [vmem:[#allocation11 + $0x4d4] ss:$28 sps:$4 sm:$0xff]  }
 0x388   :  { %4083 = vmatpush1.bf16.msra.mxu1 %v5659_v50  ;;  %v5754_v50 = vld [vmem:[#allocation11 + $0x4dc] ss:$28 sps:$4 sm:$0xff]  }
 0x389   :  { %4084 = vmatprep.subr.bf16.mxu1 %v5667_v51  ;;  %v2368_v51 = vrot.slane %v6363_v9, %v6338_v34 }
 0x38c   :  { %4085 = vmatpush1.bf16.msra.mxu1 %v5665_v52  ;;  %v5749_v52 = vld [vmem:[#allocation11 + $0x4d0] ss:$28 sps:$4 sm:$0xff]  }
 0x38d   :  { %4086 = vmatprep.subr.bf16.mxu1 %v5673_v53  ;;  %v5752_v53 = vld [vmem:[#allocation11 + $0x4d8] ss:$28 sps:$4 sm:$0xff]  }
 0x390   :  { %4087 = vmatpush1.bf16.msra.mxu1 %v5671_v54  ;;  %v5757_v54 = vld [vmem:[#allocation11 + $0x50c] ss:$28 sps:$4 sm:$0xff]  }
 0x391   :  { %4088 = vmatprep.subr.bf16.mxu1 %v5679_v55  ;;  %v5760_v55 = vld [vmem:[#allocation11 + $0x514] ss:$28 sps:$4 sm:$0xff]  }
 0x394   :  { %4089 = vmatpush1.bf16.msra.mxu1 %v5677_v56 }
 0x395   :  { %4090 = vmatprep.subr.bf16.mxu1 %v5685_v57 }
 0x398   :  { %4091 = vmatpush1.bf16.msra.mxu1 %v5683_v58 }
 0x399   :  { %4092 = vmatprep.subr.bf16.mxu1 %v5691_v59 }
 0x39c   :  { %4093 = vmatpush1.bf16.msra.mxu1 %v5689_v60  ;;  %v5755_v60 = vld [vmem:[#allocation11 + $0x508] ss:$28 sps:$4 sm:$0xff]  }
 0x39d   :  { %4094 = vmatprep.subr.bf16.mxu1 %v5697_v61  ;;  %v5758_v61 = vld [vmem:[#allocation11 + $0x510] ss:$28 sps:$4 sm:$0xff]  }
 0x3a0   :  { %4095 = vmatpush1.bf16.msra.mxu1 %v5695_v62 }
 0x3a1   :  { %4096 = vmatprep.subr.bf16.mxu1 %v5703_v63  ;;  %v5763_v63 = vld [vmem:[#allocation11 + $0x544] ss:$28 sps:$4 sm:$0xff]  }
 0x3a4   :  { %4097 = vmatpush1.bf16.msra.mxu1 %v5701_v2 }
 0x3a5   :  { %4098 = vmatprep.subr.bf16.mxu1 %v5709_v3  ;;  %v5761_v3 = vld [vmem:[#allocation11 + $0x540] ss:$28 sps:$4 sm:$0xff]  }
 0x3a8   :  { %4099 = vmatpush1.bf16.msra.mxu1 %v5707_v6  ;;  %v5772_v6 = vld [vmem:[#allocation11 + $0x584] ss:$28 sps:$4 sm:$0xff]  }
 0x3a9   :  { %4109 = vmatprep.subr.bf16.mxu1 %v5715_v7  ;;  %v5767_v7 = vld [vmem:[#allocation11 + $0x578] ss:$28 sps:$4 sm:$0xff]  }
 0x41e   :  { %v2567_v12 = vpop.f32.mrb[4].mxu1 }
 0x41f   :  { %v2568_v13 = vadd.f32 %v2567_v12, %v2356_v10  ;;  %v2569_v14 = vpop.f32.mrb[5].mxu1  ;;  %v5775_v10 = vld [vmem:[#allocation11 + $0x5b4] ss:$28 sps:$4 sm:$0xff]  }
 0x420   :  { %v2570_v15 = vadd.f32 %v2569_v14, %v2360_v11  ;;  %v2571_v17 = vpop.f32.mrb[6].mxu1  ;;  %v5778_v11 = vld [vmem:[#allocation11 + $0x5bc] ss:$28 sps:$4 sm:$0xff]   ;;  %v5773_v12 = vld [vmem:[#allocation11 + $0x5b0] ss:$28 sps:$4 sm:$0xff]  }
 0x421   :  { %v2615_v18 = vmax.f32 %v2568_v13, 0.0  ;;  %v2572_v19 = vpop.f32.mrb[7].mxu1  ;;  %v5776_v13 = vld [vmem:[#allocation11 + $0x5b8] ss:$28 sps:$4 sm:$0xff]   ;;  %v5781_v14 = vld [vmem:[#allocation11 + $0x5ec] ss:$28 sps:$4 sm:$0xff]  }
 0x422   :  { %v2616_v20 = vmax.f32 %v2570_v15, 0.0  ;;  %v5784_v15 = vld [vmem:[#allocation11 + $0x5f4] ss:$28 sps:$4 sm:$0xff]   ;;  %v5779_v17 = vld [vmem:[#allocation11 + $0x5e8] ss:$28 sps:$4 sm:$0xff]  }
 0x423   :  { %v6371_v25 = vpack.c.bf16 %v2615_v18, %v2615_v18  ;;  %v5782_v18 = vld [vmem:[#allocation11 + $0x5f0] ss:$28 sps:$4 sm:$0xff]   ;;  %v5787_v19 = vld [vmem:[#allocation11 + $0x624] ss:$28 sps:$4 sm:$0xff]  }
 0x424   :  { %v6369_v21 = vpack.c.bf16 %v2616_v20, %v2616_v20  ;;  %v5790_v20 = vld [vmem:[#allocation11 + $0x62c] ss:$28 sps:$4 sm:$0xff]  }
 0x426   :  { %4100 = vmatprep.mubr.bf16.mxu1 %v6369_v21  ;;  %4182 = vmatprep.mubr.bf16.mxu0 %v6369_v21 }
 0x427   :  { %4101 = vmatmul.mubr.bf16.vlgmr.msra.gmra.mrb[12].mxu1 %v6371_v25  ;;  %4183 = vmatmul.mubr.bf16.vlgmr.msra.gmra.mrb[8].mxu0 %v6371_v25 }
 0x428   :  { %4110 = vmatpush1.bf16.msra.mxu1 %v5713_v22  ;;  %4192 = vmatpush1.bf16.msra.mxu0 %v5716_v23  ;;  %v5785_v22 = vld [vmem:[#allocation11 + $0x620] ss:$28 sps:$4 sm:$0xff]   ;;  %v5788_v23 = vld [vmem:[#allocation11 + $0x628] ss:$28 sps:$4 sm:$0xff]  }
 0x429   :  { %4111 = vmatprep.subr.bf16.mxu1 %v5721_v26  ;;  %4193 = vmatprep.subr.bf16.mxu0 %v5724_v27  ;;  %v5793_v26 = vld [vmem:[#allocation11 + $0x65c] ss:$28 sps:$4 sm:$0xff]   ;;  %v5796_v27 = vld [vmem:[#allocation11 + $0x664] ss:$28 sps:$4 sm:$0xff]  }
 0x42c   :  { %4112 = vmatpush1.bf16.msra.mxu1 %v5719_v28  ;;  %4194 = vmatpush1.bf16.msra.mxu0 %v5722_v24  ;;  %v5791_v28 = vld [vmem:[#allocation11 + $0x658] ss:$28 sps:$4 sm:$0xff]   ;;  %v5794_v24 = vld [vmem:[#allocation11 + $0x660] ss:$28 sps:$4 sm:$0xff]  }
 0x42d   :  { %4113 = vmatprep.subr.bf16.mxu1 %v5727_v29  ;;  %4195 = vmatprep.subr.bf16.mxu0 %v5730_v32  ;;  %v2364_v29 = vrot.slane %v6363_v9, %v6349_v16  ;;  %v5799_v32 = vld [vmem:[#allocation11 + $0x694] ss:$28 sps:$4 sm:$0xff]  }
 0x42e   :  { %v5811_v9 = vld [vmem:[#allocation11 + $0x14] ss:$28 sps:$4 sm:$0xff]  }
 0x430   :  { %4114 = vmatpush1.bf16.msra.mxu1 %v5725_v35  ;;  %4196 = vmatpush1.bf16.msra.mxu0 %v5728_v36  ;;  %v5802_v35 = vld [vmem:[#allocation11 + $0x69c] ss:$28 sps:$4 sm:$0xff]   ;;  %v5797_v36 = vld [vmem:[#allocation11 + $0x690] ss:$28 sps:$4 sm:$0xff]  }
 0x431   :  { %4115 = vmatprep.subr.bf16.mxu1 %v5733_v37  ;;  %4197 = vmatprep.subr.bf16.mxu0 %v5736_v38  ;;  %v5800_v37 = vld [vmem:[#allocation11 + $0x698] ss:$28 sps:$4 sm:$0xff]  }
 0x434   :  { %4116 = vmatpush1.bf16.msra.mxu1 %v5731_v39  ;;  %4198 = vmatpush1.bf16.msra.mxu0 %v5734_v40  ;;  %v5805_v39 = vld [vmem:[#allocation11 + $0x6cc] ss:$28 sps:$4 sm:$0xff]   ;;  %v5808_v40 = vld [vmem:[#allocation11 + $0x6d4] ss:$28 sps:$4 sm:$0xff]  }
 0x435   :  { %4117 = vmatprep.subr.bf16.mxu1 %v5739_v41  ;;  %4199 = vmatprep.subr.bf16.mxu0 %v5742_v42  ;;  %v5803_v41 = vld [vmem:[#allocation11 + $0x6c8] ss:$28 sps:$4 sm:$0xff]   ;;  %v5806_v42 = vld [vmem:[#allocation11 + $0x6d0] ss:$28 sps:$4 sm:$0xff]  }
 0x438   :  { %4118 = vmatpush1.bf16.msra.mxu1 %v5737_v43  ;;  %4200 = vmatpush1.bf16.msra.mxu0 %v5740_v44  ;;  %v5812_v44 = vld [vmem:[#allocation11 + $0x1d8] ss:$28 sps:$4 sm:$0xff]  }
 0x439   :  { %4119 = vmatprep.subr.bf16.mxu1 %v5745_v45  ;;  %4201 = vmatprep.subr.bf16.mxu0 %v5748_v46  ;;  %v5809_v45 = vld [vmem:[#allocation11 + $0x10] ss:$28 sps:$4 sm:$0xff]  }
 0x43c   :  { %4120 = vmatpush1.bf16.msra.mxu1 %v5743_v47  ;;  %4202 = vmatpush1.bf16.msra.mxu0 %v5746_v48  ;;  %v5813_v47 = vld [vmem:[#allocation11 + $0x18] ss:$28 sps:$4 sm:$0xff]   ;;  %v5816_v48 = vld [vmem:[#allocation11 + $0x4c] ss:$28 sps:$4 sm:$0xff]  }
 0x43d   :  { %4121 = vmatprep.subr.bf16.mxu1 %v5751_v49  ;;  %4203 = vmatprep.subr.bf16.mxu0 %v5754_v50  ;;  %v5817_v49 = vld [vmem:[#allocation11 + $0x210] ss:$28 sps:$4 sm:$0xff]   ;;  %v5814_v50 = vld [vmem:[#allocation11 + $0x48] ss:$28 sps:$4 sm:$0xff]  }
 0x43e   :  { %v6379_v56 = vpop.f32.mrb[8].mxu1 }
 0x43f   :  { %v2610_v57 = vpop.f32.mrb[9].mxu1  ;;  %v2609_v38 = vadd.f32 %v6379_v56, %v2364_v29  ;;  %v5826_v56 = vld [vmem:[#allocation11 + $0xbc] ss:$28 sps:$4 sm:$0xff]  }
 0x440   :  { %v2611_v58 = vadd.f32 %v2610_v57, %v2368_v51  ;;  %v2612_v59 = vpop.f32.mrb[10].mxu1  ;;  %4122 = vmatpush1.bf16.msra.mxu1 %v5749_v52  ;;  %4204 = vmatpush1.bf16.msra.mxu0 %v5752_v53  ;;  %v5818_v51 = vld [vmem:[#allocation11 + $0x50] ss:$28 sps:$4 sm:$0xff]   ;;  %v5821_v52 = vld [vmem:[#allocation11 + $0x84] ss:$28 sps:$4 sm:$0xff]  }
 0x441   :  { %v2613_v62 = vpop.f32.mrb[11].mxu1  ;;  %4123 = vmatprep.subr.bf16.mxu1 %v5757_v54  ;;  %4205 = vmatprep.subr.bf16.mxu0 %v5760_v55  ;;  %v2617_v43 = vmax.f32 %v2609_v38, 0.0  ;;  %v5822_v53 = vld [vmem:[#allocation11 + $0x248] ss:$28 sps:$4 sm:$0xff]   ;;  %v5819_v54 = vld [vmem:[#allocation11 + $0x80] ss:$28 sps:$4 sm:$0xff]  }
 0x442   :  { %v2618_v1 = vmax.f32 %v2611_v58, 0.0  ;;  %v5823_v55 = vld [vmem:[#allocation11 + $0x88] ss:$28 sps:$4 sm:$0xff]   ;;  %v5827_v57 = vld [vmem:[#allocation11 + $0x280] ss:$28 sps:$4 sm:$0xff]  }
 0x443   :  { %v6388_v46 = vpack.c.bf16 %v2617_v43, %v2617_v43  ;;  %v5824_v58 = vld [vmem:[#allocation11 + $0xb8] ss:$28 sps:$4 sm:$0xff]   ;;  %v5828_v59 = vld [vmem:[#allocation11 + $0xc0] ss:$28 sps:$4 sm:$0xff]   ;;  %v5869_v38 = vld [vmem:[#allocation11 + $0x2b0] ss:$28 sps:$4 sm:$0xff]  }
 0x444   :  { %v6381_v2 = vpack.c.bf16 %v2618_v1, %v2618_v1  ;;  %4124 = vmatpush1.bf16.msra.mxu1 %v5755_v60  ;;  %4206 = vmatpush1.bf16.msra.mxu0 %v5758_v61  ;;  %v5831_v60 = vld [vmem:[#allocation11 + $0xf4] ss:$28 sps:$4 sm:$0xff]   ;;  %v5834_v1 = vld [vmem:[#allocation11 + $0x128] ss:$28 sps:$4 sm:$0xff]   ;;  %v5867_v29 = vld [vmem:[#allocation11 + $0x600] ss:$28 sps:$4 sm:$0xff]  }
 0x445   :  { %4125 = vmatprep.subr.bf16.mxu1 %v5763_v63  ;;  %4207 = vmatprep.subr.bf16.mxu0 %v5766_v0  ;;  %v5829_v61 = vld [vmem:[#allocation11 + $0xf0] ss:$28 sps:$4 sm:$0xff]   ;;  %v5833_v62 = vld [vmem:[#allocation11 + $0xf8] ss:$28 sps:$4 sm:$0xff]  }
 0x446   :  { %4141 = vmatprep.mubr.bf16.mxu1 %v6381_v2  ;;  %4223 = vmatprep.mubr.bf16.mxu0 %v6381_v2  ;;  %v5836_v63 = vld [vmem:[#allocation11 + $0x12c] ss:$28 sps:$4 sm:$0xff]  }
 0x447   :  { %v5837_v0 = vld [vmem:[#allocation11 + $0x2f0] ss:$28 sps:$4 sm:$0xff]  }
 0x448   :  { %4126 = vmatpush1.bf16.msra.mxu1 %v5761_v3  ;;  %4208 = vmatpush1.bf16.msra.mxu0 %v5764_v4  ;;  %v5838_v3 = vld [vmem:[#allocation11 + $0x130] ss:$28 sps:$4 sm:$0xff]   ;;  %v5841_v4 = vld [vmem:[#allocation11 + $0x164] ss:$28 sps:$4 sm:$0xff]  }
 0x449   :  { %4127 = vmatprep.subr.bf16.mxu1 %v5769_v5  ;;  %4209 = vmatprep.subr.bf16.mxu0 %v5772_v6  ;;  %v5842_v5 = vld [vmem:[#allocation11 + $0x328] ss:$28 sps:$4 sm:$0xff]   ;;  %v5839_v6 = vld [vmem:[#allocation11 + $0x160] ss:$28 sps:$4 sm:$0xff]   ;;  %v5878_v43 = vld [vmem:[#allocation11 + $0x4b0] ss:$28 sps:$4 sm:$0xff]  }
 0x44c   :  { %4128 = vmatpush1.bf16.msra.mxu1 %v5767_v7  ;;  %4210 = vmatpush1.bf16.msra.mxu0 %v5770_v8  ;;  %v5843_v7 = vld [vmem:[#allocation11 + $0x168] ss:$28 sps:$4 sm:$0xff]   ;;  %v5846_v8 = vld [vmem:[#allocation11 + $0x19c] ss:$28 sps:$4 sm:$0xff]  }
 0x44d   :  { %4129 = vmatprep.subr.bf16.mxu1 %v5775_v10  ;;  %4211 = vmatprep.subr.bf16.mxu0 %v5778_v11  ;;  %v5847_v10 = vld [vmem:[#allocation11 + $0x360] ss:$28 sps:$4 sm:$0xff]   ;;  %v5844_v11 = vld [vmem:[#allocation11 + $0x198] ss:$28 sps:$4 sm:$0xff]  }
 0x450   :  { %4130 = vmatpush1.bf16.msra.mxu1 %v5773_v12  ;;  %4212 = vmatpush1.bf16.msra.mxu0 %v5776_v13  ;;  %v5848_v12 = vld [vmem:[#allocation11 + $0x1a0] ss:$28 sps:$4 sm:$0xff]   ;;  %v5851_v13 = vld [vmem:[#allocation11 + $0x1d4] ss:$28 sps:$4 sm:$0xff]  }
 0x451   :  { %4131 = vmatprep.subr.bf16.mxu1 %v5781_v14  ;;  %4213 = vmatprep.subr.bf16.mxu0 %v5784_v15  ;;  %v5852_v14 = vld [vmem:[#allocation11 + $0x558] ss:$28 sps:$4 sm:$0xff]   ;;  %v5849_v15 = vld [vmem:[#allocation11 + $0x1d0] ss:$28 sps:$4 sm:$0xff]  }
 0x454   :  { %4132 = vmatpush1.bf16.msra.mxu1 %v5779_v17  ;;  %4214 = vmatpush1.bf16.msra.mxu0 %v5782_v18  ;;  %v5853_v17 = vld [vmem:[#allocation11 + $0x398] ss:$28 sps:$4 sm:$0xff]   ;;  %v5856_v18 = vld [vmem:[#allocation11 + $0x20c] ss:$28 sps:$4 sm:$0xff]  }
 0x455   :  { %4133 = vmatprep.subr.bf16.mxu1 %v5787_v19  ;;  %4215 = vmatprep.subr.bf16.mxu0 %v5790_v20  ;;  %v5857_v19 = vld [vmem:[#allocation11 + $0x590] ss:$28 sps:$4 sm:$0xff]   ;;  %v5854_v20 = vld [vmem:[#allocation11 + $0x208] ss:$28 sps:$4 sm:$0xff]  }
 0x458   :  { %4134 = vmatpush1.bf16.msra.mxu1 %v5785_v22  ;;  %4216 = vmatpush1.bf16.msra.mxu0 %v5788_v23  ;;  %v5858_v22 = vld [vmem:[#allocation11 + $0x3d0] ss:$28 sps:$4 sm:$0xff]   ;;  %v5861_v23 = vld [vmem:[#allocation11 + $0x244] ss:$28 sps:$4 sm:$0xff]  }
 0x459   :  { %4135 = vmatprep.subr.bf16.mxu1 %v5793_v26  ;;  %4217 = vmatprep.subr.bf16.mxu0 %v5796_v27  ;;  %v5862_v26 = vld [vmem:[#allocation11 + $0x5c8] ss:$28 sps:$4 sm:$0xff]   ;;  %v5859_v27 = vld [vmem:[#allocation11 + $0x240] ss:$28 sps:$4 sm:$0xff]  }
 0x45c   :  { %4136 = vmatpush1.bf16.msra.mxu1 %v5791_v28  ;;  %4218 = vmatpush1.bf16.msra.mxu0 %v5794_v24  ;;  %v5863_v28 = vld [vmem:[#allocation11 + $0x408] ss:$28 sps:$4 sm:$0xff]   ;;  %v5866_v24 = vld [vmem:[#allocation11 + $0x27c] ss:$28 sps:$4 sm:$0xff]  }
 0x45d   :  { %4137 = vmatprep.subr.bf16.mxu1 %v5799_v32  ;;  %4219 = vmatprep.subr.bf16.mxu0 %v5802_v35  ;;  %v5864_v32 = vld [vmem:[#allocation11 + $0x278] ss:$28 sps:$4 sm:$0xff]   ;;  %v5868_v35 = vld [vmem:[#allocation11 + $0x440] ss:$28 sps:$4 sm:$0xff]  }
 0x460   :  { %4138 = vmatpush1.bf16.msra.mxu1 %v5797_v36  ;;  %4220 = vmatpush1.bf16.msra.mxu0 %v5800_v37  ;;  %v5871_v36 = vld [vmem:[#allocation11 + $0x2b4] ss:$28 sps:$4 sm:$0xff]  }
 0x461   :  { %4139 = vmatprep.subr.bf16.mxu1 %v5805_v39  ;;  %4221 = vmatprep.subr.bf16.mxu0 %v5808_v40  ;;  %v5872_v37 = vld [vmem:[#allocation11 + $0x638] ss:$28 sps:$4 sm:$0xff]   ;;  %v5876_v40 = vld [vmem:[#allocation11 + $0x2ec] ss:$28 sps:$4 sm:$0xff]  }
 0x462   :  { %v5873_v39 = vld [vmem:[#allocation11 + $0x478] ss:$28 sps:$4 sm:$0xff]  }
 0x464   :  { %4140 = vmatpush1.bf16.msra.mxu1 %v5803_v41  ;;  %4222 = vmatpush1.bf16.msra.mxu0 %v5806_v42  ;;  %v5877_v41 = vld [vmem:[#allocation11 + $0x670] ss:$28 sps:$4 sm:$0xff]   ;;  %v5874_v42 = vld [vmem:[#allocation11 + $0x2e8] ss:$28 sps:$4 sm:$0xff]  }
 0x465   :  { %4232 = vmatprep.subr.bf16.mxu1 %v5811_v9  ;;  %5026 = vmatprep.subr.bf16.mxu0 %v5812_v44  ;;  %v5881_v9 = vld [vmem:[#allocation11 + $0x324] ss:$28 sps:$4 sm:$0xff]  }
 0x466   :  { %v5882_v44 = vld [vmem:[#allocation11 + $0x6a8] ss:$28 sps:$4 sm:$0xff]  }
 0x467   :  { %4142 = vmatmul.mubr.bf16.vlgmr.msra.gmra.mrb[12].mxu1 %v6388_v46  ;;  %4224 = vmatmul.mubr.bf16.vlgmr.msra.gmra.mrb[8].mxu0 %v6388_v46 }
 0x468   :  { %4233 = vmatpush1.bf16.msra.mxu1 %v5809_v45  ;;  %4264 = vmatprep.mubr.bf16.mxu1 %v6369_v21  ;;  %v5879_v45 = vld [vmem:[#allocation11 + $0x320] ss:$28 sps:$4 sm:$0xff]  }
 0x469   :  { %5027 = vmatpush3.bf16.msra.mxu0 %v5813_v47  ;;  %4346 = vmatprep.mubr.bf16.mxu0 %v6369_v21  ;;  %v5832_v21 = vld [vmem:[#allocation11 + $0x2b8] ss:$28 sps:$4 sm:$0xff]   ;;  %v5883_v47 = vld [vmem:[#allocation11 + $0x4e8] ss:$28 sps:$4 sm:$0xff]  }
 0x46a   :  { %4234 = vmatprep.subr.bf16.mxu1 %v5816_v48  ;;  %5028 = vmatprep.subr.bf16.mxu0 %v5817_v49  ;;  %v5886_v48 = vld [vmem:[#allocation11 + $0x35c] ss:$28 sps:$4 sm:$0xff]  }
 0x46b   :  { %v5887_v49 = vld [vmem:[#allocation11 + $0x6e0] ss:$28 sps:$4 sm:$0xff]  }
 0x46c   :  { %4235 = vmatpush1.bf16.msra.mxu1 %v5814_v50  ;;  %v5884_v50 = vld [vmem:[#allocation11 + $0x358] ss:$28 sps:$4 sm:$0xff]  }
 0x46d   :  { %5029 = vmatpush3.bf16.msra.mxu0 %v5818_v51  ;;  %4236 = vmatprep.subr.bf16.mxu1 %v5821_v52  ;;  %v5888_v51 = vld [vmem:[#allocation11 + $0x520] ss:$28 sps:$4 sm:$0xff]   ;;  %v5891_v52 = vld [vmem:[#allocation11 + $0x394] ss:$28 sps:$4 sm:$0xff]  }
 0x46e   :  { %5030 = vmatprep.subr.bf16.mxu0 %v5822_v53  ;;  %v5889_v53 = vld [vmem:[#allocation11 + $0x390] ss:$28 sps:$4 sm:$0xff]  }
 0x470   :  { %4237 = vmatpush1.bf16.msra.mxu1 %v5819_v54  ;;  %v5894_v54 = vld [vmem:[#allocation11 + $0x3cc] ss:$28 sps:$4 sm:$0xff]  }
 0x471   :  { %5031 = vmatpush3.bf16.msra.mxu0 %v5823_v55  ;;  %4238 = vmatprep.subr.bf16.mxu1 %v5826_v56  ;;  %v5892_v55 = vld [vmem:[#allocation11 + $0x3c8] ss:$28 sps:$4 sm:$0xff]  }
 0x472   :  { %5032 = vmatprep.subr.bf16.mxu0 %v5827_v57  ;;  %v5897_v56 = vld [vmem:[#allocation11 + $0x404] ss:$28 sps:$4 sm:$0xff]  }
 0x473   :  { %v5895_v57 = vld [vmem:[#allocation11 + $0x400] ss:$28 sps:$4 sm:$0xff]  }
 0x474   :  { %4239 = vmatpush1.bf16.msra.mxu1 %v5824_v58  ;;  %v5900_v58 = vld [vmem:[#allocation11 + $0x43c] ss:$28 sps:$4 sm:$0xff]  }
 0x475   :  { %5033 = vmatpush3.bf16.msra.mxu0 %v5828_v59  ;;  %4240 = vmatprep.subr.bf16.mxu1 %v5831_v60  ;;  %v5898_v59 = vld [vmem:[#allocation11 + $0x438] ss:$28 sps:$4 sm:$0xff]  }
 0x476   :  { %5034 = vmatprep.subr.bf16.mxu0 %v5832_v21  ;;  %v5903_v60 = vld [vmem:[#allocation11 + $0x474] ss:$28 sps:$4 sm:$0xff]  }
 0x477   :  { %v5901_v21 = vld [vmem:[#allocation11 + $0x470] ss:$28 sps:$4 sm:$0xff]  }
 0x478   :  { %4241 = vmatpush1.bf16.msra.mxu1 %v5829_v61  ;;  %v5904_v61 = vld [vmem:[#allocation11 + $0x4a8] ss:$28 sps:$4 sm:$0xff]  }
 0x479   :  { %5035 = vmatpush3.bf16.msra.mxu0 %v5833_v62  ;;  %4242 = vmatprep.subr.bf16.mxu1 %v5836_v63  ;;  %v5909_v62 = vld [vmem:[#allocation11 + $0x4e4] ss:$28 sps:$4 sm:$0xff]   ;;  %v5912_v63 = vld [vmem:[#allocation11 + $0x51c] ss:$28 sps:$4 sm:$0xff]  }
 0x47a   :  { %5036 = vmatprep.subr.bf16.mxu0 %v5837_v0  ;;  %v5910_v0 = vld [vmem:[#allocation11 + $0x518] ss:$28 sps:$4 sm:$0xff]  }
 0x47c   :  { %4243 = vmatpush1.bf16.msra.mxu1 %v5834_v1  ;;  %v5915_v1 = vld [vmem:[#allocation11 + $0x554] ss:$28 sps:$4 sm:$0xff]  }
 0x47d   :  { %5037 = vmatpush3.bf16.msra.mxu0 %v5838_v3  ;;  %4244 = vmatprep.subr.bf16.mxu1 %v5841_v4  ;;  %v5913_v3 = vld [vmem:[#allocation11 + $0x550] ss:$28 sps:$4 sm:$0xff]  }
 0x47e   :  { %5038 = vmatprep.subr.bf16.mxu0 %v5842_v5  ;;  %v5918_v4 = vld [vmem:[#allocation11 + $0x58c] ss:$28 sps:$4 sm:$0xff]  }
 0x47f   :  { %v5916_v5 = vld [vmem:[#allocation11 + $0x588] ss:$28 sps:$4 sm:$0xff]  }
 0x480   :  { %4245 = vmatpush1.bf16.msra.mxu1 %v5839_v6  ;;  %v5921_v6 = vld [vmem:[#allocation11 + $0x5c4] ss:$28 sps:$4 sm:$0xff]  }
 0x481   :  { %5039 = vmatpush3.bf16.msra.mxu0 %v5843_v7  ;;  %4246 = vmatprep.subr.bf16.mxu1 %v5846_v8  ;;  %v5919_v7 = vld [vmem:[#allocation11 + $0x5c0] ss:$28 sps:$4 sm:$0xff]  }
 0x482   :  { %5040 = vmatprep.subr.bf16.mxu0 %v5847_v10  ;;  %v5924_v8 = vld [vmem:[#allocation11 + $0x5fc] ss:$28 sps:$4 sm:$0xff]  }
 0x483   :  { %v5922_v10 = vld [vmem:[#allocation11 + $0x5f8] ss:$28 sps:$4 sm:$0xff]  }
 0x484   :  { %4247 = vmatpush1.bf16.msra.mxu1 %v5844_v11  ;;  %v5927_v11 = vld [vmem:[#allocation11 + $0x634] ss:$28 sps:$4 sm:$0xff]  }
 0x485   :  { %5041 = vmatpush3.bf16.msra.mxu0 %v5848_v12  ;;  %4248 = vmatprep.subr.bf16.mxu1 %v5851_v13  ;;  %v5925_v12 = vld [vmem:[#allocation11 + $0x630] ss:$28 sps:$4 sm:$0xff]  }
 0x486   :  { %5048 = vmatprep.subr.bf16.mxu0 %v5852_v14  ;;  %v5930_v13 = vld [vmem:[#allocation11 + $0x66c] ss:$28 sps:$4 sm:$0xff]  }
 0x487   :  { %v5928_v14 = vld [vmem:[#allocation11 + $0x668] ss:$28 sps:$4 sm:$0xff]  }
 0x488   :  { %4347 = vmatmul.mubr.bf16.vlgmr.msra.gmra.mrb[12].mxu0 %v6371_v25  ;;  %4249 = vmatpush1.bf16.msra.mxu1 %v5849_v15  ;;  %v5933_v15 = vld [vmem:[#allocation11 + $0x6a4] ss:$28 sps:$4 sm:$0xff]  }
 0x489   :  { %5049 = vmatpush3.bf16.msra.mxu0 %v5853_v17  ;;  %4386 = vmatprep.mubr.bf16.mxu0 %v6381_v2  ;;  %v5931_v17 = vld [vmem:[#allocation11 + $0x6a0] ss:$28 sps:$4 sm:$0xff]  }
 0x48a   :  { %4250 = vmatprep.subr.bf16.mxu1 %v5856_v18  ;;  %5050 = vmatprep.subr.bf16.mxu0 %v5857_v19  ;;  %v5936_v18 = vld [vmem:[#allocation11 + $0x6dc] ss:$28 sps:$4 sm:$0xff]  }
 0x48b   :  { %v5934_v19 = vld [vmem:[#allocation11 + $0x6d8] ss:$28 sps:$4 sm:$0xff]  }
 0x48c   :  { %4251 = vmatpush1.bf16.msra.mxu1 %v5854_v20  ;;  %v6403_v20 = vld [vmem:[%s6452_s9] sm:$0xff]  ;;  %s6166_s9 = smov [#allocation13]  }
 0x48d   :  { %5051 = vmatpush3.bf16.msra.mxu0 %v5858_v22  ;;  %4252 = vmatprep.subr.bf16.mxu1 %v5861_v23  ;;  %v2884_v22 = vrot.slane %v6403_v20, %v6327_v31  ;;  %v2892_v23 = vrot.slane %v6403_v20, %v6349_v16  ;;  %s4449_s4 = sshll.u32 %s6166_s9, 4  ;;  %s4450_s4 = int_to_ptr.vmem [resolvable:$true] %s4449_s4 }
 0x48e   :  { %5052 = vmatprep.subr.bf16.mxu0 %v5862_v26  ;;  %v2888_v26 = vrot.slane %v6403_v20, %v6335_v33  ;;  %s6097_s20 = scalar_lea.vmem %s4450_s4, 256  ;;  %p6102_p7 = scmp.lt.s32.totalorder %s4450_s4, %s4450_s4 }
 0x48f   :  { %p6098_p6 = scmp.ne.s32.totalorder %s4450_s4, %s6097_s20  ;;  %p6103_p8 = scmp.lt.s32.totalorder %s6097_s20, %s6097_s20 }
 0x490   :  { %4253 = vmatpush1.bf16.msra.mxu1 %v5859_v27  ;;  %v2896_v27 = vrot.slane %v6403_v20, %v6338_v34 }
 0x491   :  { %5053 = vmatpush3.bf16.msra.mxu0 %v5863_v28  ;;  %4254 = vmatprep.subr.bf16.mxu1 %v5866_v24  ;;  %p6104_p9 = por %p6103_p8, %p6102_p7 }
 0x492   :  { %5054 = vmatprep.subr.bf16.mxu0 %v5867_v29 }
 0x493   :  { %p6105_p10 = pnand %p6104_p9, %p6098_p6 }
 0x494   :  { %4255 = vmatpush1.bf16.msra.mxu1 %v5864_v32 }
 0x495   :  { %5055 = vmatpush3.bf16.msra.mxu0 %v5868_v35  ;;  %4256 = vmatprep.subr.bf16.mxu1 %v5871_v36 }
 0x496   :  { %5056 = vmatprep.subr.bf16.mxu0 %v5872_v37 }
 0x498   :  { %4257 = vmatpush1.bf16.msra.mxu1 %v5869_v38 }
 0x499   :  { %5057 = vmatpush3.bf16.msra.mxu0 %v5873_v39  ;;  %4258 = vmatprep.subr.bf16.mxu1 %v5876_v40 }
 0x49a   :  { %5058 = vmatprep.subr.bf16.mxu0 %v5877_v41 }
 0x49c   :  { %4259 = vmatpush1.bf16.msra.mxu1 %v5874_v42 }
 0x49d   :  { %5059 = vmatpush3.bf16.msra.mxu0 %v5878_v43  ;;  %4260 = vmatprep.subr.bf16.mxu1 %v5881_v9 }
 0x49e   :  { %5060 = vmatprep.subr.bf16.mxu0 %v5882_v44 }
 0x4a0   :  { %4261 = vmatpush1.bf16.msra.mxu1 %v5879_v45 }
 0x4a1   :  { %5061 = vmatpush3.bf16.msra.mxu0 %v5883_v47  ;;  %4262 = vmatprep.subr.bf16.mxu1 %v5886_v48 }
 0x4a2   :  { %5062 = vmatprep.subr.bf16.mxu0 %v5887_v49 }
 0x4a4   :  { %4263 = vmatpush1.bf16.msra.mxu1 %v5884_v50 }
 0x4a5   :  { %5063 = vmatpush3.bf16.msra.mxu0 %v5888_v51  ;;  %4273 = vmatprep.subr.bf16.mxu1 %v5891_v52 }
 0x4a7   :  { %4265 = vmatmul.mubr.bf16.vlgmr.msra.gmra.mrb[16].mxu1 %v6371_v25  ;;  %v5906_v25 = vld [vmem:[#allocation11 + $0x4ac] ss:$28 sps:$4 sm:$0xff]  }
 0x4a8   :  { %4387 = vmatmul.mubr.bf16.vlgmr.msra.gmra.mrb[16].mxu0 %v6388_v46  ;;  %4274 = vmatpush1.bf16.msra.mxu1 %v5889_v53 }
 0x4a9   :  { %4305 = vmatprep.mubr.bf16.mxu1 %v6381_v2  ;;  %4275 = vmatprep.subr.bf16.mxu1 %v5894_v54  ;;  %v5907_v2 = vld [vmem:[#allocation11 + $0x4e0] ss:$28 sps:$4 sm:$0xff]  }
 0x4ac   :  { %4276 = vmatpush1.bf16.msra.mxu1 %v5892_v55 }
 0x4ad   :  { %4277 = vmatprep.subr.bf16.mxu1 %v5897_v56 }
 0x4b0   :  { %4278 = vmatpush1.bf16.msra.mxu1 %v5895_v57 }
 0x4b1   :  { %4279 = vmatprep.subr.bf16.mxu1 %v5900_v58 }
 0x4b4   :  { %4280 = vmatpush1.bf16.msra.mxu1 %v5898_v59 }
 0x4b5   :  { %4281 = vmatprep.subr.bf16.mxu1 %v5903_v60 }
 0x4b8   :  { %4282 = vmatpush1.bf16.msra.mxu1 %v5901_v21 }
 0x4b9   :  { %4283 = vmatprep.subr.bf16.mxu1 %v5906_v25 }
 0x4bc   :  { %4284 = vmatpush1.bf16.msra.mxu1 %v5904_v61 }
 0x4bd   :  { %4285 = vmatprep.subr.bf16.mxu1 %v5909_v62 }
 0x4c0   :  { %4286 = vmatpush1.bf16.msra.mxu1 %v5907_v2 }
 0x4c1   :  { %4287 = vmatprep.subr.bf16.mxu1 %v5912_v63 }
 0x4c4   :  { %4288 = vmatpush1.bf16.msra.mxu1 %v5910_v0 }
 0x4c5   :  { %4289 = vmatprep.subr.bf16.mxu1 %v5915_v1 }
 0x4c8   :  { %4290 = vmatpush1.bf16.msra.mxu1 %v5913_v3 }
 0x4c9   :  { %4291 = vmatprep.subr.bf16.mxu1 %v5918_v4 }
 0x4cc   :  { %4292 = vmatpush1.bf16.msra.mxu1 %v5916_v5 }
 0x4cd   :  { %4293 = vmatprep.subr.bf16.mxu1 %v5921_v6 }
 0x4d0   :  { %4294 = vmatpush1.bf16.msra.mxu1 %v5919_v7 }
 0x4d1   :  { %4295 = vmatprep.subr.bf16.mxu1 %v5924_v8 }
 0x4d4   :  { %4296 = vmatpush1.bf16.msra.mxu1 %v5922_v10 }
 0x4d5   :  { %4297 = vmatprep.subr.bf16.mxu1 %v5927_v11 }
 0x4d8   :  { %4298 = vmatpush1.bf16.msra.mxu1 %v5925_v12 }
 0x4d9   :  { %4299 = vmatprep.subr.bf16.mxu1 %v5930_v13 }
 0x4dc   :  { %4300 = vmatpush1.bf16.msra.mxu1 %v5928_v14 }
 0x4dd   :  { %4301 = vmatprep.subr.bf16.mxu1 %v5933_v15 }
 0x4e0   :  { %4302 = vmatpush1.bf16.msra.mxu1 %v5931_v17 }
 0x4e1   :  { %4303 = vmatprep.subr.bf16.mxu1 %v5936_v18 }
 0x4e4   :  { %4304 = vmatpush1.bf16.msra.mxu1 %v5934_v19 }
 0x4e7   :  { %4306 = vmatmul.mubr.bf16.vlgmr.msra.gmra.mrb[16].mxu1 %v6388_v46 }
 0x53a   :  { %v4143_v28 = vpop.f32.mrb[12].mxu1  ;;  %v4225_v24 = vpop.f32.mrb[8].mxu0 }
 0x53b   :  { %v5076_v46 = vadd.f32 %v4143_v28, %v2884_v22  ;;  %v5078_v29 = vadd.f32 %v4225_v24, %v2892_v23  ;;  %v4145_v32 = vpop.f32.mrb[13].mxu1  ;;  %v4227_v35 = vpop.f32.mrb[9].mxu0 }
 0x53c   :  { %v5077_v36 = vadd.f32 %v4145_v32, %v2888_v26  ;;  %v5079_v37 = vadd.f32 %v4227_v35, %v2896_v27  ;;  %v4147_v38 = vpop.f32.mrb[14].mxu1  ;;  %v4229_v39 = vpop.f32.mrb[10].mxu0 }
 0x53d   :  { %v5019_v31 = vmul.f32 -1.442695, %v5076_v46  ;;  %v5021_v40 = vmul.f32 -1.442695, %v5078_v29  ;;  %v4148_v41 = vpop.f32.mrb[15].mxu1  ;;  %v4230_v16 = vpop.f32.mrb[11].mxu0 }
 0x53e   :  { %v5020_v42 = vmul.f32 -1.442695, %v5077_v36  ;;  %v5022_v43 = vmul.f32 -1.442695, %v5079_v37 }
 0x53f   :  { %5937 = vpow2.f32 %v5019_v31 }
 0x540   :  { %5939 = vpow2.f32 %v5021_v40 }
 0x541   :  { %5941 = vpow2.f32 %v5020_v42 }
 0x542   :  { %5943 = vpow2.f32 %v5022_v43 }
 0x549   :  { %v5938_v33 = vpop.eup %5937 }
 0x54a   :  { %v5940_v34 = vpop.eup %5939  ;;  %v4415_v9 = vadd.f32 1.0, %v5938_v33 }
 0x54b   :  { %v5942_v44 = vpop.eup %5941  ;;  %v4417_v45 = vadd.f32 1.0, %v5940_v34 }
 0x54c   :  { %v5944_v47 = vpop.eup %5943  ;;  %5945 = vrcp.f32 %v4415_v9  ;;  %v4416_v48 = vadd.f32 1.0, %v5942_v44 }
 0x54d   :  { %5947 = vrcp.f32 %v4417_v45  ;;  %v4418_v49 = vadd.f32 1.0, %v5944_v47 }
 0x54e   :  { %5949 = vrcp.f32 %v4416_v48 }
 0x54f   :  { %5951 = vrcp.f32 %v4418_v49 }
 0x556   :  { %v5946_v50 = vpop.eup %5945 }
 0x557   :  { %v5948_v51 = vpop.eup %5947  ;;  %4436 = vst [vmem:[#allocation14] sm:$0xff] %v5946_v50 }
 0x558   :  { %v5950_v52 = vpop.eup %5949  ;;  %4438 = vst [vmem:[#allocation14 + $0x10] sm:$0xff] %v5948_v51 }
 0x559   :  { %v5952_v53 = vpop.eup %5951  ;;  %4437 = vst [vmem:[#allocation14 + $0x8] sm:$0xff] %v5950_v52 }
 0x55a   :  { %4439 = vst [vmem:[#allocation14 + $0x18] sm:$0xff] %v5952_v53 }
 0x55b   :  { %v5042_v54 = vpop.f32.mrb[12].mxu0 }
 0x55c   :  { %6108 = shalt.err (!%p6105_p10)
}
 0x55d   :  { %s6109_s19 = scalar_lea.hbm %s6453_s10, 256 }
 0x55e   :  { %p6110_p11 = scmp.ne.s32.totalorder %s6453_s10, %s6109_s19  ;;  %p6113_p12 = scmp.lt.u32.totalorder %s6109_s19, %s6453_s10 }
 0x560   :  { %p6115_p13 = pnand %p6113_p12, %p6110_p11 }
 0x562   :  { %6118 = shalt.err (!%p6115_p13)
}
 0x563   :  { %4452 = dma.vmem_to_hbm [thread:$0]  %s4450_s4, 256, %s6453_s10, [#allocation4]   ;;  %v5043_v55 = vpop.f32.mrb[13].mxu0  ;;  %v2907_v59 = vsub.s32 6, %v6324_v30  ;;  %v2899_v6 = vsub.s32 4, %v6324_v30  ;;  %v2903_v7 = vsub.s32 5, %v6324_v30 }
 0x564   :  { %v5044_v56 = vadd.f32 %v5043_v55, %v5042_v54  ;;  %v5045_v57 = vpop.f32.mrb[14].mxu0  ;;  %s6167_s10 = smov [#allocation14]  }
 0x565   :  { %v5046_v58 = vpop.f32.mrb[15].mxu0  ;;  %v2908_v60 = vrot.slane %v6403_v20, %v2907_v59  ;;  %v2900_v8 = vrot.slane %v6403_v20, %v2899_v6  ;;  %v2904_v10 = vrot.slane %v6403_v20, %v2903_v7  ;;  %s4459_s23 = sshll.u32 %s6167_s10, 4  ;;  %s4460_s23 = int_to_ptr.vmem [resolvable:$true] %s4459_s23 }
 0x566   :  { %s6119_s24 = scalar_lea.vmem %s4460_s23, 896  ;;  %p6124_p1 = scmp.lt.s32.totalorder %s4460_s23, %s4460_s23 }
 0x567   :  { %v4349_v61 = vadd.f32 %v5044_v56, %v2908_v60  ;;  %p6120_p0 = scmp.ne.s32.totalorder %s4460_s23, %s6119_s24  ;;  %p6125_p2 = scmp.lt.s32.totalorder %s6119_s24, %s6119_s24 }
 0x569   :  { %p6126_p3 = por %p6125_p2, %p6124_p1 }
 0x56b   :  { %p6127_p4 = pnand %p6126_p3, %p6120_p0 }
 0x57b   :  { %v5064_v21 = vpop.f32.mrb[16].mxu0 }
 0x57c   :  { %v5065_v25 = vpop.f32.mrb[17].mxu0 }
 0x57d   :  { %v5066_v62 = vadd.f32 %v5065_v25, %v5064_v21  ;;  %v5067_v2 = vpop.f32.mrb[18].mxu0 }
 0x57e   :  { %v5068_v63 = vpop.f32.mrb[19].mxu0 }
 0x57f   :  { %v4389_v0 = vadd.f32 %v5066_v62, %v4349_v61 }
 0x581   :  { %v5025_v1 = vmul.f32 -1.442695, %v4389_v0 }
 0x583   :  { %5953 = vpow2.f32 %v5025_v1 }
 0x58d   :  { %v5954_v3 = vpop.eup %5953 }
 0x58e   :  { %v4421_v4 = vadd.f32 1.0, %v5954_v3 }
 0x590   :  { %5955 = vrcp.f32 %v4421_v4 }
 0x59a   :  { %v5956_v5 = vpop.eup %5955 }
 0x59b   :  { %4442 = vst [vmem:[#allocation14 + $0x30] sm:$0xff] %v5956_v5 }
 0x5ba   :  { %v4307_v11 = vpop.f32.mrb[16].mxu1 }
 0x5bb   :  { %v5080_v12 = vadd.f32 %v4307_v11, %v2900_v8  ;;  %v4309_v13 = vpop.f32.mrb[17].mxu1 }
 0x5bc   :  { %v5081_v14 = vadd.f32 %v4309_v13, %v2904_v10  ;;  %v4311_v15 = vpop.f32.mrb[18].mxu1 }
 0x5bd   :  { %v5023_v17 = vmul.f32 -1.442695, %v5080_v12  ;;  %v4312_v18 = vpop.f32.mrb[19].mxu1 }
 0x5be   :  { %v5024_v19 = vmul.f32 -1.442695, %v5081_v14 }
 0x5bf   :  { %5957 = vpow2.f32 %v5023_v17 }
 0x5c0   :  { %5959 = vpow2.f32 %v5024_v19 }
 0x5c9   :  { %v5958_v22 = vpop.eup %5957 }
 0x5ca   :  { %v5960_v23 = vpop.eup %5959  ;;  %v4419_v26 = vadd.f32 1.0, %v5958_v22 }
 0x5cb   :  { %v4420_v27 = vadd.f32 1.0, %v5960_v23 }
 0x5cc   :  { %5961 = vrcp.f32 %v4419_v26 }
 0x5cd   :  { %5963 = vrcp.f32 %v4420_v27 }
 0x5d6   :  { %v5962_v30 = vpop.eup %5961 }
 0x5d7   :  { %v5964_v20 = vpop.eup %5963  ;;  %4440 = vst [vmem:[#allocation14 + $0x20] sm:$0xff] %v5962_v30 }
 0x5d8   :  { %4441 = vst [vmem:[#allocation14 + $0x28] sm:$0xff] %v5964_v20 }
 0x5d9   :  { %6130 = shalt.err (!%p6127_p4)
}
 0x5da   :  { %s6131_s29 = scalar_lea.hbm %s6454_s11, 896 }
 0x5db   :  { %p6132_p5 = scmp.ne.s32.totalorder %s6454_s11, %s6131_s29  ;;  %p6135_p6 = scmp.lt.u32.totalorder %s6131_s29, %s6454_s11 }
 0x5dd   :  { %p6137_p7 = pnand %p6135_p6, %p6132_p5 }
 0x5df   :  { %6140 = shalt.err (!%p6137_p7)
}
 0x5e0   :  { %4462 = dma.vmem_to_hbm [thread:$0]  %s4460_s23, 896, %s6454_s11, [#allocation15]  }
 0x5e1   :  { %6149 = dma.done.wait [#allocation4], 256  }
 0x5e2   :  { %6150 = vsyncadd [#allocation4], 4294967040 }
 0x5e3   :  { %6151 = dma.done.wait [#allocation15], 896  }
 0x5e4   :  { %6152 = vsyncadd [#allocation15], 4294966400 }
 0x5e5   :  { %4469 = vsyncpa [#allocation3], 1 }
 0x5e6   :  { %4470 = vsyncpa [#allocation6], 1 }
 0x5e7   :  { %4471 = vsyncpa [#allocation9], 1 }
 0x5e8   :  { %4472 = vsyncpa [#allocation12], 1 }
 0x5e9   :  { %4473 = vsyncpa [#allocation4], 1 }
 0x5ea   :  { %4474 = vsyncpa [#allocation15], 1 }

</bundles_post_ra>
